<compile_context>
chip_gen: v5e
topology: v5e:2x2
jax: 0.10.0
libtpu: 0.0.40
codegen_flags: <defaults>
</compile_context>

<pallas_src>
import functools

import numpy as np
import jax
import jax.numpy as jnp
from jax.experimental import pallas as pl
from jax.experimental.pallas import tpu as pltpu

LANES = 128          # TPU lane width
IMG = 16             # spatial size (H = W = 16)
INPUT_DIM = 3        # hyperparameters['input_dim_a']
GEN_DIM = 8          # hyperparameters['gen']['dim'] (representative)
ROWPAD = 24          # padded row-count for all row-pad/upsample matrices (mult of 8)


# ---------------------------------------------------------------------------
# Host-side packing: fold taps / channels / column padding / stride / upsample
# into banded (kh*128, 128) bf16 RHS matrices and tiny 0/1 row matrices.
# Row-slab layout for every activation: A[y, x*C + c] == act(y, x, c).
# ---------------------------------------------------------------------------
def _band_rhs_stride1(w, w_in, pad):
    kh, kw, cin, cout = w.shape
    assert w_in * cin <= LANES and w_in * cout <= LANES
    v = np.zeros((kh, LANES, LANES), np.float32)
    for i in range(kh):
        for x in range(w_in):                 # output width == input width
            for j in range(kw):
                xu = x + j - pad              # unpadded input column
                if 0 <= xu < w_in:
                    v[i, xu * cin:(xu + 1) * cin, x * cout:(x + 1) * cout] += w[i, j]
    return v.reshape(kh * LANES, LANES)


def _band_rhs_stride2(w, w_in, pad):
    kh, kw, cin, cout = w.shape
    w_out = w_in // 2
    assert w_in * cin <= LANES and w_out * cout <= LANES
    v = np.zeros((kh, LANES, LANES), np.float32)
    for i in range(kh):
        for x in range(w_out):
            for j in range(kw):
                xu = 2 * x + j - pad
                if 0 <= xu < w_in:
                    v[i, xu * cin:(xu + 1) * cin, x * cout:(x + 1) * cout] += w[i, j]
    return v.reshape(kh * LANES, LANES)


def _band_rhs_upsample(w, w_lo, pad):
    """Nearest-2x column upsample folded into a stride-1 conv (dec1)."""
    kh, kw, cin, cout = w.shape
    w_out = 2 * w_lo
    assert w_lo * cin <= LANES and w_out * cout <= LANES
    v = np.zeros((kh, LANES, LANES), np.float32)
    for i in range(kh):
        for x in range(w_out):
            for j in range(kw):
                su = x + j - pad              # column in the (unpadded) upsampled image
                if 0 <= su < w_out:
                    x2 = su // 2              # low-res source column
                    v[i, x2 * cin:(x2 + 1) * cin, x * cout:(x + 1) * cout] += w[i, j]
    return v.reshape(kh * LANES, LANES)


def _row_pad(h, pad):
    m = np.zeros((ROWPAD, h), np.float32)
    m[pad:pad + h, :] = np.eye(h, dtype=np.float32)
    return m


def _row_upsample_pad(h_lo, pad):
    m = np.zeros((ROWPAD, h_lo), np.float32)
    for r in range(2 * h_lo):
        m[r + pad, r // 2] = 1.0
    return m


def _row_subsample(h_out, h_in):
    m = np.zeros((h_out, h_in), np.float32)
    for y in range(h_out):
        m[y, 2 * y] = 1.0
    return m


def _bias_row(b, w_out):
    cout = b.shape[0]
    row = np.zeros((LANES,), np.float32)
    row[:w_out * cout] = np.tile(b, w_out)
    return row


def init_params(key, input_dim=INPUT_DIM, dim=GEN_DIM):
    ks = jax.random.split(key, 8)
    std = 0.05
    w = lambda k, s: np.asarray(jax.random.normal(k, s, jnp.float32)) * std
    b = lambda k, c: np.asarray(jax.random.normal(k, (c,), jnp.float32)) * std
    raw = {
        "w1": w(ks[0], (7, 7, input_dim, dim)),   "b1": b(ks[4], dim),
        "w2": w(ks[1], (4, 4, dim, 2 * dim)),     "b2": b(ks[5], 2 * dim),
        "w3": w(ks[2], (5, 5, 2 * dim, dim)),     "b3": b(ks[6], dim),
        "w4": w(ks[3], (7, 7, dim, input_dim)),   "b4": b(ks[7], input_dim),
    }
    packed = {
        "pad3":  jnp.asarray(_row_pad(IMG, 3)),                 # (24, 16)
        "pad1":  jnp.asarray(_row_pad(IMG, 1)),                 # (24, 16)
        "uprow": jnp.asarray(_row_upsample_pad(IMG // 2, 2)),   # (24, 8)
        "sub2":  jnp.asarray(_row_subsample(IMG // 2, IMG)),    # (8, 16)
        "rhs1":  jnp.asarray(_band_rhs_stride1(raw["w1"], IMG, 3), jnp.bfloat16),
        "rhs2":  jnp.asarray(_band_rhs_stride2(raw["w2"], IMG, 1), jnp.bfloat16),
        "rhs3":  jnp.asarray(_band_rhs_upsample(raw["w3"], IMG // 2, 2), jnp.bfloat16),
        "rhs4":  jnp.asarray(_band_rhs_stride1(raw["w4"], IMG, 3), jnp.bfloat16),
        "brow":  jnp.asarray(np.stack([_bias_row(raw["b1"], IMG),
                                       _bias_row(raw["b2"], IMG // 2),
                                       _bias_row(raw["b3"], IMG),
                                       _bias_row(raw["b4"], IMG)])),   # (4, 128)
    }
    return raw, packed


# ---------------------------------------------------------------------------
# Fused kernel: one grid step per image; everything in registers/VMEM.
# ---------------------------------------------------------------------------
def _music_fused_kernel(x_ref, pad3_ref, pad1_ref, uprow_ref, sub2_ref,
                        rhs1_ref, rhs2_ref, rhs3_ref, rhs4_ref, brow_ref,
                        o_ref):
    f32 = jnp.float32

    def band_dot(rows, rhs_ref, kh):
        # rows: (ROWPAD, 128) f32 padded-row activation.  K-packed LHS from kh
        # lane-aligned row-window slices -> ONE MXU dot (bf16 in, f32 acc).
        lhs = jnp.concatenate([rows[i:i + IMG, :] for i in range(kh)], axis=1)
        return jnp.dot(lhs.astype(jnp.bfloat16), rhs_ref[...],
                       preferred_element_type=f32)

    x2d = x_ref[0]                                                   # (16, 128)

    # enc1: 7x7 s1 p3, 3 -> 8, relu
    xp1 = jnp.dot(pad3_ref[...], x2d, preferred_element_type=f32)    # (24, 128)
    h1 = jnp.maximum(band_dot(xp1, rhs1_ref, 7) + brow_ref[0:1, :], 0.0)

    # enc2: 4x4 s2 p1, 8 -> 16, relu (W-stride folded in rhs2, H-stride via sub2)
    xp2 = jnp.dot(pad1_ref[...], h1, preferred_element_type=f32)     # (24, 128)
    t2 = band_dot(xp2, rhs2_ref, 4)                                  # (16, 128)
    h2 = jnp.maximum(jnp.dot(sub2_ref[...], t2, preferred_element_type=f32)
                     + brow_ref[1:2, :], 0.0)                        # (8, 128)

    # dec1: nearest-2x upsample (folded into uprow/rhs3) + 5x5 s1 p2, 16 -> 8, relu
    xp3 = jnp.dot(uprow_ref[...], h2, preferred_element_type=f32)    # (24, 128)
    h3 = jnp.maximum(band_dot(xp3, rhs3_ref, 5) + brow_ref[2:3, :], 0.0)

    # dec2: 7x7 s1 p3, 8 -> 3, sigmoid -> mask (lanes 0..47 real)
    xp4 = jnp.dot(pad3_ref[...], h3, preferred_element_type=f32)     # (24, 128)
    mask = jax.nn.sigmoid(band_dot(xp4, rhs4_ref, 7) + brow_ref[3:4, :])

    # masking epilogue (enhance=None): ((mask*(x*0.5+0.5)) - 0.5)*2 = mask*x + mask - 1
    o_ref[0] = mask * x2d + (mask - 1.0)


def music_trainer_forward(packed, x_nchw):
    """MUSIC_Trainer.forward: x_ba = masking(gen.decode(gen.encode(x_b)), x_b)."""
    n, c, h, w = x_nchw.shape
    assert (c, h, w) == (INPUT_DIM, IMG, IMG), "packed weights specialized to 3x16x16"
    # NCHW -> per-image row slab (H, W*C), lane-padded to 128.
    x2d = jnp.transpose(x_nchw.astype(jnp.float32), (0, 2, 3, 1)).reshape(n, IMG, IMG * c)
    x2d = jnp.pad(x2d, ((0, 0), (0, 0), (0, LANES - IMG * c)))

    full = lambda a: pl.BlockSpec(a.shape, lambda b: (0, 0))
    out = pl.pallas_call(
        _music_fused_kernel,
        out_shape=jax.ShapeDtypeStruct((n, IMG, LANES), jnp.float32),
        grid=(n,),
        in_specs=[
            pl.BlockSpec((1, IMG, LANES), lambda b: (b, 0, 0)),
            full(packed["pad3"]), full(packed["pad1"]),
            full(packed["uprow"]), full(packed["sub2"]),
            full(packed["rhs1"]), full(packed["rhs2"]),
            full(packed["rhs3"]), full(packed["rhs4"]),
            full(packed["brow"]),
        ],
        out_specs=pl.BlockSpec((1, IMG, LANES), lambda b: (b, 0, 0)),
        compiler_params=pltpu.CompilerParams(dimension_semantics=("parallel",)),
    )(x2d, packed["pad3"], packed["pad1"], packed["uprow"], packed["sub2"],
      packed["rhs1"], packed["rhs2"], packed["rhs3"], packed["rhs4"], packed["brow"])

    x_ba = out[:, :, :IMG * c].reshape(n, IMG, IMG, c)
    return jnp.transpose(x_ba, (0, 3, 1, 2))                         # NHWC -> NCHW


# ---------------------------------------------------------------------------
# Pure-JAX reference (torch semantics) for numeric validation.
# ---------------------------------------------------------------------------
def reference_forward(raw, x_nchw):
    x = jnp.transpose(x_nchw.astype(jnp.float32), (0, 2, 3, 1))
    conv = functools.partial(jax.lax.conv_general_dilated,
                             dimension_numbers=("NHWC", "HWIO", "NHWC"),
                             precision=jax.lax.Precision.HIGHEST)
    h = jax.nn.relu(conv(x, jnp.asarray(raw["w1"]), (1, 1), [(3, 3), (3, 3)]) + raw["b1"])
    h = jax.nn.relu(conv(h, jnp.asarray(raw["w2"]), (2, 2), [(1, 1), (1, 1)]) + raw["b2"])
    h = jnp.repeat(jnp.repeat(h, 2, axis=1), 2, axis=2)
    h = jax.nn.relu(conv(h, jnp.asarray(raw["w3"]), (1, 1), [(2, 2), (2, 2)]) + raw["b3"])
    m = jax.nn.sigmoid(conv(h, jnp.asarray(raw["w4"]), (1, 1), [(3, 3), (3, 3)]) + raw["b4"])
    out = (m * (x * 0.5 + 0.5) - 0.5) * 2.0
    return jnp.transpose(out, (0, 3, 1, 2))


# ---------------------------------------------------------------------------
# Main
# ---------------------------------------------------------------------------
if __name__ == "__main__":
    key = jax.random.PRNGKey(0)
    k_param, k_data = jax.random.split(key)

    batch = 2
    raw, packed = init_params(k_param)
    x_b = jax.random.uniform(k_data, (batch, INPUT_DIM, IMG, IMG),
                             jnp.float32, minval=-1.0, maxval=1.0)

    fwd = jax.jit(music_trainer_forward)
    out = fwd(packed, x_b)
    jax.block_until_ready(out)

    assert out.shape == (batch, INPUT_DIM, IMG, IMG)
    assert out.dtype == jnp.float32

    ref = reference_forward(raw, x_b)
    err = float(jnp.max(jnp.abs(out - ref)))
    assert np.isfinite(err) and err < 1e-2, f"max abs error vs reference: {err}"

    print("KERNEL_OK")
</pallas_src>

<mosaic_0001>
module attributes {stable_mosaic.version = 11 : i64} {
  func.func @_music_fused_kernel(%arg0: i32, %arg1: memref<1x16x128xf32, #tpu.memory_space<vmem>>, %arg2: memref<24x16xf32, #tpu.memory_space<vmem>>, %arg3: memref<24x16xf32, #tpu.memory_space<vmem>>, %arg4: memref<24x8xf32, #tpu.memory_space<vmem>>, %arg5: memref<8x16xf32, #tpu.memory_space<vmem>>, %arg6: memref<896x128xbf16, #tpu.memory_space<vmem>>, %arg7: memref<512x128xbf16, #tpu.memory_space<vmem>>, %arg8: memref<640x128xbf16, #tpu.memory_space<vmem>>, %arg9: memref<896x128xbf16, #tpu.memory_space<vmem>>, %arg10: memref<4x128xf32, #tpu.memory_space<vmem>>, %arg11: memref<1x16x128xf32, #tpu.memory_space<vmem>>) attributes {dimension_semantics = [#tpu.dimension_semantics<parallel>], iteration_bounds = array<i64: 2>, scalar_prefetch = 0 : i64, scratch_operands = 0 : i64, tpu.core_type = #tpu.core_type<tc>, window_params = [{transform_indices = @transform_0, window_bounds = array<i64: 1, 16, 128>}, {pipeline_mode = #tpu.pipeline_mode<synchronous>, transform_indices = @transform_1, window_bounds = array<i64: 24, 16>}, {pipeline_mode = #tpu.pipeline_mode<synchronous>, transform_indices = @transform_2, window_bounds = array<i64: 24, 16>}, {pipeline_mode = #tpu.pipeline_mode<synchronous>, transform_indices = @transform_3, window_bounds = array<i64: 24, 8>}, {pipeline_mode = #tpu.pipeline_mode<synchronous>, transform_indices = @transform_4, window_bounds = array<i64: 8, 16>}, {pipeline_mode = #tpu.pipeline_mode<synchronous>, transform_indices = @transform_5, window_bounds = array<i64: 896, 128>}, {pipeline_mode = #tpu.pipeline_mode<synchronous>, transform_indices = @transform_6, window_bounds = array<i64: 512, 128>}, {pipeline_mode = #tpu.pipeline_mode<synchronous>, transform_indices = @transform_7, window_bounds = array<i64: 640, 128>}, {pipeline_mode = #tpu.pipeline_mode<synchronous>, transform_indices = @transform_8, window_bounds = array<i64: 896, 128>}, {pipeline_mode = #tpu.pipeline_mode<synchronous>, transform_indices = @transform_9, window_bounds = array<i64: 4, 128>}, {transform_indices = @transform_10, window_bounds = array<i64: 1, 16, 128>}]} {
    %c0 = arith.constant 0 : index
    %c0_0 = arith.constant 0 : index
    %c0_1 = arith.constant 0 : index
    %0 = vector.load %arg1[%c0, %c0_0, %c0_1] : memref<1x16x128xf32, #tpu.memory_space<vmem>>, vector<1x16x128xf32>
    %1 = vector.shape_cast %0 : vector<1x16x128xf32> to vector<16x128xf32>
    %c0_2 = arith.constant 0 : index
    %c0_3 = arith.constant 0 : index
    %2 = vector.load %arg2[%c0_2, %c0_3] : memref<24x16xf32, #tpu.memory_space<vmem>>, vector<24x16xf32>
    %cst = arith.constant dense<0.000000e+00> : vector<24x128xf32>
    %3 = tpu.matmul %2, %1, %cst {dimension_numbers = #tpu.dot_dimension_numbers<[1], [0], [0], [1], [0, 0, 1, 1], [], []>} : vector<24x16xf32>, vector<16x128xf32>, vector<24x128xf32> -> vector<24x128xf32>
    %4 = vector.extract_strided_slice %3 {offsets = [0, 0], sizes = [16, 128], strides = [1, 1]} : vector<24x128xf32> to vector<16x128xf32>
    %5 = vector.extract_strided_slice %3 {offsets = [1, 0], sizes = [16, 128], strides = [1, 1]} : vector<24x128xf32> to vector<16x128xf32>
    %6 = vector.extract_strided_slice %3 {offsets = [2, 0], sizes = [16, 128], strides = [1, 1]} : vector<24x128xf32> to vector<16x128xf32>
    %7 = vector.extract_strided_slice %3 {offsets = [3, 0], sizes = [16, 128], strides = [1, 1]} : vector<24x128xf32> to vector<16x128xf32>
    %8 = vector.extract_strided_slice %3 {offsets = [4, 0], sizes = [16, 128], strides = [1, 1]} : vector<24x128xf32> to vector<16x128xf32>
    %9 = vector.extract_strided_slice %3 {offsets = [5, 0], sizes = [16, 128], strides = [1, 1]} : vector<24x128xf32> to vector<16x128xf32>
    %10 = vector.extract_strided_slice %3 {offsets = [6, 0], sizes = [16, 128], strides = [1, 1]} : vector<24x128xf32> to vector<16x128xf32>
    %11 = tpu.concatenate %4, %5, %6, %7, %8, %9, %10 in 1 : vector<16x128xf32>, vector<16x128xf32>, vector<16x128xf32>, vector<16x128xf32>, vector<16x128xf32>, vector<16x128xf32>, vector<16x128xf32> -> vector<16x896xf32>
    %12 = arith.truncf %11 : vector<16x896xf32> to vector<16x896xbf16>
    %c0_4 = arith.constant 0 : index
    %c0_5 = arith.constant 0 : index
    %13 = vector.load %arg6[%c0_4, %c0_5] : memref<896x128xbf16, #tpu.memory_space<vmem>>, vector<896x128xbf16>
    %cst_6 = arith.constant dense<0.000000e+00> : vector<16x128xf32>
    %14 = tpu.matmul %12, %13, %cst_6 {dimension_numbers = #tpu.dot_dimension_numbers<[1], [0], [0], [1], [0, 0, 1, 1], [], []>} : vector<16x896xbf16>, vector<896x128xbf16>, vector<16x128xf32> -> vector<16x128xf32>
    %c0_7 = arith.constant 0 : index
    %c0_8 = arith.constant 0 : index
    %15 = vector.load %arg10[%c0_7, %c0_8] : memref<4x128xf32, #tpu.memory_space<vmem>>, vector<1x128xf32>
    %16 = vector.broadcast %15 : vector<1x128xf32> to vector<16x128xf32>
    %17 = arith.addf %14, %16 : vector<16x128xf32>
    %cst_9 = arith.constant 0.000000e+00 : f32
    %18 = vector.broadcast %cst_9 : f32 to vector<16x128xf32>
    %19 = arith.maximumf %17, %18 : vector<16x128xf32>
    %c0_10 = arith.constant 0 : index
    %c0_11 = arith.constant 0 : index
    %20 = vector.load %arg3[%c0_10, %c0_11] : memref<24x16xf32, #tpu.memory_space<vmem>>, vector<24x16xf32>
    %cst_12 = arith.constant dense<0.000000e+00> : vector<24x128xf32>
    %21 = tpu.matmul %20, %19, %cst_12 {dimension_numbers = #tpu.dot_dimension_numbers<[1], [0], [0], [1], [0, 0, 1, 1], [], []>} : vector<24x16xf32>, vector<16x128xf32>, vector<24x128xf32> -> vector<24x128xf32>
    %22 = vector.extract_strided_slice %21 {offsets = [0, 0], sizes = [16, 128], strides = [1, 1]} : vector<24x128xf32> to vector<16x128xf32>
    %23 = vector.extract_strided_slice %21 {offsets = [1, 0], sizes = [16, 128], strides = [1, 1]} : vector<24x128xf32> to vector<16x128xf32>
    %24 = vector.extract_strided_slice %21 {offsets = [2, 0], sizes = [16, 128], strides = [1, 1]} : vector<24x128xf32> to vector<16x128xf32>
    %25 = vector.extract_strided_slice %21 {offsets = [3, 0], sizes = [16, 128], strides = [1, 1]} : vector<24x128xf32> to vector<16x128xf32>
    %26 = tpu.concatenate %22, %23, %24, %25 in 1 : vector<16x128xf32>, vector<16x128xf32>, vector<16x128xf32>, vector<16x128xf32> -> vector<16x512xf32>
    %27 = arith.truncf %26 : vector<16x512xf32> to vector<16x512xbf16>
    %c0_13 = arith.constant 0 : index
    %c0_14 = arith.constant 0 : index
    %28 = vector.load %arg7[%c0_13, %c0_14] : memref<512x128xbf16, #tpu.memory_space<vmem>>, vector<512x128xbf16>
    %cst_15 = arith.constant dense<0.000000e+00> : vector<16x128xf32>
    %29 = tpu.matmul %27, %28, %cst_15 {dimension_numbers = #tpu.dot_dimension_numbers<[1], [0], [0], [1], [0, 0, 1, 1], [], []>} : vector<16x512xbf16>, vector<512x128xbf16>, vector<16x128xf32> -> vector<16x128xf32>
    %c0_16 = arith.constant 0 : index
    %c0_17 = arith.constant 0 : index
    %30 = vector.load %arg5[%c0_16, %c0_17] : memref<8x16xf32, #tpu.memory_space<vmem>>, vector<8x16xf32>
    %cst_18 = arith.constant dense<0.000000e+00> : vector<8x128xf32>
    %31 = tpu.matmul %30, %29, %cst_18 {dimension_numbers = #tpu.dot_dimension_numbers<[1], [0], [0], [1], [0, 0, 1, 1], [], []>} : vector<8x16xf32>, vector<16x128xf32>, vector<8x128xf32> -> vector<8x128xf32>
    %c1 = arith.constant 1 : index
    %c0_19 = arith.constant 0 : index
    %32 = vector.load %arg10[%c1, %c0_19] : memref<4x128xf32, #tpu.memory_space<vmem>>, vector<1x128xf32>
    %33 = vector.broadcast %32 : vector<1x128xf32> to vector<8x128xf32>
    %34 = arith.addf %31, %33 : vector<8x128xf32>
    %cst_20 = arith.constant 0.000000e+00 : f32
    %35 = vector.broadcast %cst_20 : f32 to vector<8x128xf32>
    %36 = arith.maximumf %34, %35 : vector<8x128xf32>
    %c0_21 = arith.constant 0 : index
    %c0_22 = arith.constant 0 : index
    %37 = vector.load %arg4[%c0_21, %c0_22] : memref<24x8xf32, #tpu.memory_space<vmem>>, vector<24x8xf32>
    %cst_23 = arith.constant dense<0.000000e+00> : vector<24x128xf32>
    %38 = tpu.matmul %37, %36, %cst_23 {dimension_numbers = #tpu.dot_dimension_numbers<[1], [0], [0], [1], [0, 0, 1, 1], [], []>} : vector<24x8xf32>, vector<8x128xf32>, vector<24x128xf32> -> vector<24x128xf32>
    %39 = vector.extract_strided_slice %38 {offsets = [0, 0], sizes = [16, 128], strides = [1, 1]} : vector<24x128xf32> to vector<16x128xf32>
    %40 = vector.extract_strided_slice %38 {offsets = [1, 0], sizes = [16, 128], strides = [1, 1]} : vector<24x128xf32> to vector<16x128xf32>
    %41 = vector.extract_strided_slice %38 {offsets = [2, 0], sizes = [16, 128], strides = [1, 1]} : vector<24x128xf32> to vector<16x128xf32>
    %42 = vector.extract_strided_slice %38 {offsets = [3, 0], sizes = [16, 128], strides = [1, 1]} : vector<24x128xf32> to vector<16x128xf32>
    %43 = vector.extract_strided_slice %38 {offsets = [4, 0], sizes = [16, 128], strides = [1, 1]} : vector<24x128xf32> to vector<16x128xf32>
    %44 = tpu.concatenate %39, %40, %41, %42, %43 in 1 : vector<16x128xf32>, vector<16x128xf32>, vector<16x128xf32>, vector<16x128xf32>, vector<16x128xf32> -> vector<16x640xf32>
    %45 = arith.truncf %44 : vector<16x640xf32> to vector<16x640xbf16>
    %c0_24 = arith.constant 0 : index
    %c0_25 = arith.constant 0 : index
    %46 = vector.load %arg8[%c0_24, %c0_25] : memref<640x128xbf16, #tpu.memory_space<vmem>>, vector<640x128xbf16>
    %cst_26 = arith.constant dense<0.000000e+00> : vector<16x128xf32>
    %47 = tpu.matmul %45, %46, %cst_26 {dimension_numbers = #tpu.dot_dimension_numbers<[1], [0], [0], [1], [0, 0, 1, 1], [], []>} : vector<16x640xbf16>, vector<640x128xbf16>, vector<16x128xf32> -> vector<16x128xf32>
    %c2 = arith.constant 2 : index
    %c0_27 = arith.constant 0 : index
    %48 = vector.load %arg10[%c2, %c0_27] : memref<4x128xf32, #tpu.memory_space<vmem>>, vector<1x128xf32>
    %49 = vector.broadcast %48 : vector<1x128xf32> to vector<16x128xf32>
    %50 = arith.addf %47, %49 : vector<16x128xf32>
    %cst_28 = arith.constant 0.000000e+00 : f32
    %51 = vector.broadcast %cst_28 : f32 to vector<16x128xf32>
    %52 = arith.maximumf %50, %51 : vector<16x128xf32>
    %c0_29 = arith.constant 0 : index
    %c0_30 = arith.constant 0 : index
    %53 = vector.load %arg2[%c0_29, %c0_30] : memref<24x16xf32, #tpu.memory_space<vmem>>, vector<24x16xf32>
    %cst_31 = arith.constant dense<0.000000e+00> : vector<24x128xf32>
    %54 = tpu.matmul %53, %52, %cst_31 {dimension_numbers = #tpu.dot_dimension_numbers<[1], [0], [0], [1], [0, 0, 1, 1], [], []>} : vector<24x16xf32>, vector<16x128xf32>, vector<24x128xf32> -> vector<24x128xf32>
    %55 = vector.extract_strided_slice %54 {offsets = [0, 0], sizes = [16, 128], strides = [1, 1]} : vector<24x128xf32> to vector<16x128xf32>
    %56 = vector.extract_strided_slice %54 {offsets = [1, 0], sizes = [16, 128], strides = [1, 1]} : vector<24x128xf32> to vector<16x128xf32>
    %57 = vector.extract_strided_slice %54 {offsets = [2, 0], sizes = [16, 128], strides = [1, 1]} : vector<24x128xf32> to vector<16x128xf32>
    %58 = vector.extract_strided_slice %54 {offsets = [3, 0], sizes = [16, 128], strides = [1, 1]} : vector<24x128xf32> to vector<16x128xf32>
    %59 = vector.extract_strided_slice %54 {offsets = [4, 0], sizes = [16, 128], strides = [1, 1]} : vector<24x128xf32> to vector<16x128xf32>
    %60 = vector.extract_strided_slice %54 {offsets = [5, 0], sizes = [16, 128], strides = [1, 1]} : vector<24x128xf32> to vector<16x128xf32>
    %61 = vector.extract_strided_slice %54 {offsets = [6, 0], sizes = [16, 128], strides = [1, 1]} : vector<24x128xf32> to vector<16x128xf32>
    %62 = tpu.concatenate %55, %56, %57, %58, %59, %60, %61 in 1 : vector<16x128xf32>, vector<16x128xf32>, vector<16x128xf32>, vector<16x128xf32>, vector<16x128xf32>, vector<16x128xf32>, vector<16x128xf32> -> vector<16x896xf32>
    %63 = arith.truncf %62 : vector<16x896xf32> to vector<16x896xbf16>
    %c0_32 = arith.constant 0 : index
    %c0_33 = arith.constant 0 : index
    %64 = vector.load %arg9[%c0_32, %c0_33] : memref<896x128xbf16, #tpu.memory_space<vmem>>, vector<896x128xbf16>
    %cst_34 = arith.constant dense<0.000000e+00> : vector<16x128xf32>
    %65 = tpu.matmul %63, %64, %cst_34 {dimension_numbers = #tpu.dot_dimension_numbers<[1], [0], [0], [1], [0, 0, 1, 1], [], []>} : vector<16x896xbf16>, vector<896x128xbf16>, vector<16x128xf32> -> vector<16x128xf32>
    %c3 = arith.constant 3 : index
    %c0_35 = arith.constant 0 : index
    %66 = vector.load %arg10[%c3, %c0_35] : memref<4x128xf32, #tpu.memory_space<vmem>>, vector<1x128xf32>
    %67 = vector.broadcast %66 : vector<1x128xf32> to vector<16x128xf32>
    %68 = arith.addf %65, %67 : vector<16x128xf32>
    %69 = arith.negf %68 : vector<16x128xf32>
    %70 = math.exp %69 : vector<16x128xf32>
    %cst_36 = arith.constant 1.000000e+00 : f32
    %71 = vector.broadcast %cst_36 : f32 to vector<16x128xf32>
    %72 = arith.addf %71, %70 : vector<16x128xf32>
    %73 = arith.divf %71, %72 : vector<16x128xf32>
    %74 = arith.mulf %73, %1 : vector<16x128xf32>
    %cst_37 = arith.constant 1.000000e+00 : f32
    %75 = vector.broadcast %cst_37 : f32 to vector<16x128xf32>
    %76 = arith.subf %73, %75 : vector<16x128xf32>
    %77 = arith.addf %74, %76 : vector<16x128xf32>
    %c0_38 = arith.constant 0 : index
    %c0_39 = arith.constant 0 : index
    %c0_40 = arith.constant 0 : index
    %78 = vector.load %arg11[%c0_38, %c0_39, %c0_40] : memref<1x16x128xf32, #tpu.memory_space<vmem>>, vector<1x16x128xf32>
    %79 = vector.shape_cast %78 : vector<1x16x128xf32> to vector<16x128xf32>
    %80 = vector.shape_cast %77 : vector<16x128xf32> to vector<1x16x128xf32>
    tpu.vector_store %arg11[%c0_38, %c0_39, %c0_40], %80 {strides = array<i32>} : memref<1x16x128xf32, #tpu.memory_space<vmem>>, vector<1x16x128xf32>,
    return
  }
  func.func @transform_0(%arg0: i32) -> (i32, i32, i32) {
    %c0_i32 = arith.constant 0 : i32
    %c0_i32_0 = arith.constant 0 : i32
    %c0_i32_1 = arith.constant 0 : i32
    return %arg0, %c0_i32, %c0_i32_0 : i32, i32, i32
  }
  func.func @transform_1(%arg0: i32) -> (i32, i32) {
    %c0_i32 = arith.constant 0 : i32
    %c0_i32_0 = arith.constant 0 : i32
    %c0_i32_1 = arith.constant 0 : i32
    return %c0_i32, %c0_i32_0 : i32, i32
  }
  func.func @transform_2(%arg0: i32) -> (i32, i32) {
    %c0_i32 = arith.constant 0 : i32
    %c0_i32_0 = arith.constant 0 : i32
    %c0_i32_1 = arith.constant 0 : i32
    return %c0_i32, %c0_i32_0 : i32, i32
  }
  func.func @transform_3(%arg0: i32) -> (i32, i32) {
    %c0_i32 = arith.constant 0 : i32
    %c0_i32_0 = arith.constant 0 : i32
    %c0_i32_1 = arith.constant 0 : i32
    return %c0_i32, %c0_i32_0 : i32, i32
  }
  func.func @transform_4(%arg0: i32) -> (i32, i32) {
    %c0_i32 = arith.constant 0 : i32
    %c0_i32_0 = arith.constant 0 : i32
    %c0_i32_1 = arith.constant 0 : i32
    return %c0_i32, %c0_i32_0 : i32, i32
  }
  func.func @transform_5(%arg0: i32) -> (i32, i32) {
    %c0_i32 = arith.constant 0 : i32
    %c0_i32_0 = arith.constant 0 : i32
    %c0_i32_1 = arith.constant 0 : i32
    return %c0_i32, %c0_i32_0 : i32, i32
  }
  func.func @transform_6(%arg0: i32) -> (i32, i32) {
    %c0_i32 = arith.constant 0 : i32
    %c0_i32_0 = arith.constant 0 : i32
    %c0_i32_1 = arith.constant 0 : i32
    return %c0_i32, %c0_i32_0 : i32, i32
  }
  func.func @transform_7(%arg0: i32) -> (i32, i32) {
    %c0_i32 = arith.constant 0 : i32
    %c0_i32_0 = arith.constant 0 : i32
    %c0_i32_1 = arith.constant 0 : i32
    return %c0_i32, %c0_i32_0 : i32, i32
  }
  func.func @transform_8(%arg0: i32) -> (i32, i32) {
    %c0_i32 = arith.constant 0 : i32
    %c0_i32_0 = arith.constant 0 : i32
    %c0_i32_1 = arith.constant 0 : i32
    return %c0_i32, %c0_i32_0 : i32, i32
  }
  func.func @transform_9(%arg0: i32) -> (i32, i32) {
    %c0_i32 = arith.constant 0 : i32
    %c0_i32_0 = arith.constant 0 : i32
    %c0_i32_1 = arith.constant 0 : i32
    return %c0_i32, %c0_i32_0 : i32, i32
  }
  func.func @transform_10(%arg0: i32) -> (i32, i32, i32) {
    %c0_i32 = arith.constant 0 : i32
    %c0_i32_0 = arith.constant 0 : i32
    %c0_i32_1 = arith.constant 0 : i32
    return %arg0, %c0_i32, %c0_i32_0 : i32, i32, i32
  }
}

</mosaic_0001>

<bundles_post_ra>
// kernel: music_trainer_forward.1
= control target key start
LH: loop header
LB: loop body
LE: loop exit
PB: predicated region body
PF: predicated region fallthrough
CT: control target
= control target key end

     0   :  { %15 = vsyncpa [#allocation3], 0  ;;  %s4155_s0 = inlined_call_operand.vmem [shape: f32[2,16,128], index: 0, kind: input, shape index: {}]   ;;  %s4156_s1 = inlined_call_operand.vmem [shape: f32[24,16], index: 1, kind: input, shape index: {}]   ;;  %s4157_s2 = inlined_call_operand.vmem [shape: f32[24,16], index: 2, kind: input, shape index: {}]   ;;  %s4158_s3 = inlined_call_operand.vmem [shape: f32[24,8], index: 3, kind: input, shape index: {}]   ;;  %s4159_s4 = inlined_call_operand.vmem [shape: f32[8,16], index: 4, kind: input, shape index: {}]   ;;  %s4160_s5 = inlined_call_operand.hbm [shape: bf16[896,128], index: 5, kind: input, shape index: {}]   ;;  %s4161_s6 = inlined_call_operand.hbm [shape: bf16[512,128], index: 6, kind: input, shape index: {}]   ;;  %s4162_s7 = inlined_call_operand.vmem [shape: bf16[640,128], index: 7, kind: input, shape index: {}]   ;;  %s4163_s8 = inlined_call_operand.hbm [shape: bf16[896,128], index: 8, kind: input, shape index: {}]   ;;  %s4164_s9 = inlined_call_operand.vmem [shape: f32[4,128], index: 9, kind: input, shape index: {}]   ;;  %s4165_s10 = inlined_call_operand.vmem [shape: f32[2,16,128], index: 10, kind: output, shape index: {}]  }
   0x1   :  { %16 = vsyncpa [#allocation5], 0  ;;  %s3868_s13 = smov 0  }
   0x2 LB: > { %s3874_s14 = sadd.s32 4294967295, %s3806_s13   ;;  %p2693_p0 = scmp.ge.s32.totalorder %s3806_s13, 1  ;;  %s3806_s13 = sphi %s3868_s13, %s22_s13  }
   0x3   : > { %p268_p1 = scmp.lt.s32.totalorder %s3806_s13, 3  ;;  %p3669_p2 = scmp.eq.s32.totalorder %s3874_s14, 0 }
   0x4   : > { %s305_s17 = sshll.u32 %s4161_s6, 4  ;;  %s291_s21 = sshll.u32 %s4160_s5, 4  ;;  %s306_s17 = int_to_ptr.hbm [resolvable:$true] %s305_s17  ;;  %s292_s21 = int_to_ptr.hbm [resolvable:$true] %s291_s21 }
   0x5   : > { %p3882_p3 = pnand %p2693_p0, %p268_p1  ;;  %s3808_s22 = smov [#allocation4]  }
   0x6   : > { %s307_s23 = sshll.u32 %s3808_s22, 4  ;;  %s3809_s24 = smov [#allocation2]   ;;  %s308_s23 = int_to_ptr.vmem [resolvable:$true] %s307_s23 }
   0x7   : > { %p3659_p4 = pneg %p3882_p3  ;;  %s293_s25 = sshll.u32 %s3809_s24, 4  ;;  %s294_s25 = int_to_ptr.vmem [resolvable:$true] %s293_s25 }
   0x8   : > { %s322_s28 = sshll.u32 %s4163_s8, 4  ;;  %s3810_s29 = smov 64   ;;  %s323_s28 = int_to_ptr.hbm [resolvable:$true] %s322_s28 }
   0x9   : > { %p3660_p5 = pnand %p3669_p2, %p3659_p4  ;;  %s3811_s30 = smov 4  }
   0xa   : > { %s3812_s11 = smov [#allocation6]   ;;  %351 = sbr.rel (%p3882_p3) target bundleno = 1408 (0x580), region = 60 }
   0xb   : > { %3665 = dma.hbm_to_vmem [thread:$0]  (!%p3660_p5), %s306_s17, 4096, %s308_s23, [#allocation5], %s3810_s29, %s3810_s29, %s3811_s30  }
   0xc   : > { %3662 = dma.hbm_to_vmem [thread:$0]  (!%p3660_p5), %s292_s21, 7168, %s294_s25, [#allocation3], %s3810_s29, %s3810_s29, %s3811_s30  }
   0xd   : > { %s324_s12 = sshll.u32 %s3812_s11, 4  ;;  %s325_s12 = int_to_ptr.vmem [resolvable:$true] %s324_s12 }
   0xe   : > { %3668 = dma.hbm_to_vmem [thread:$0]  (!%p3660_p5), %s323_s28, 7168, %s325_s12, [#allocation5], %s3810_s29, %s3810_s29, %s3811_s30  }
   0xf   : > { %3797 = dma.done.wait (%p3669_p2), [#allocation3], 7168  }
  0x10   : > { %3799 = vsyncadd (%p3669_p2), [#allocation3], 4294960128 }
  0x11   : > { %3801 = dma.done.wait (%p3669_p2), [#allocation5], 11264  }
  0x12   : > { %3803 = vsyncadd (%p3669_p2), [#allocation5], 4294956032  ;;  %p400_p6 = scmp.lt.s32.totalorder %s3874_s14, 1  ;;  %v3923_v2 = vld [vmem:[%s4156_s1] sm:$0xff]  ;;  %vm415_vm0 = vcmask 130048   ;;  %v3470_v3 = vld [vmem:[#allocation2 + $0x38] sm:$0xff] }
  0x13   : > { %v3478_v4 = vld [vmem:[#allocation2 + $0x78] sm:$0xff]  ;;  %959 = vmatpush.bf16.msra.mxu1 %v3470_v3  ;;  %v3469_v5 = vld [vmem:[#allocation2 + $0x30] sm:$0xff]  ;;  %v3468_v10 = vld [vmem:[#allocation2 + $0x28] sm:$0xff]  ;;  %vm454_vm1 = vcmask 1046528   ;;  %vm462_vm2 = vcmask 1045504   ;;  %vm470_vm3 = vcmask 1044480  }
  0x14   : > { %s4168_s14 = smov (!%p400_p6, %s3874_s14), 1  ;;  %v3486_v6 = vld [vmem:[#allocation2 + $0xb8] sm:$0xff]  ;;  %973 = vmatpush.bf16.msra.mxu2 %v3478_v4  ;;  %v3477_v7 = vld [vmem:[#allocation2 + $0x70] sm:$0xff]  ;;  %v3930_v11 = vld [vmem:[%s4156_s1 + $0x8] sm:$0xff]  ;;  %vm478_vm4 = vcmask 1043456   ;;  %vm486_vm5 = vcmask 1042432  }
  0x15   : > { %s3461_s15 = sshll.u32 %s4168_s14, 4  ;;  %987 = vmatpush.bf16.msra.mxu3 %v3486_v6  ;;  %v3485_v8 = vld [vmem:[#allocation2 + $0xb0] sm:$0xff]  ;;  %v3494_v9 = vld [vmem:[#allocation2 + $0xf8] sm:$0xff]  ;;  %v3476_v12 = vld [vmem:[#allocation2 + $0x68] sm:$0xff]  ;;  %vm494_vm6 = vcmask 1041408   ;;  %vm1467_vm7 = vcmask 64512  }
  0x16   : > { %s3916_s18 = scalar_lea.vmem %s4155_s0, %s3461_s15  ;;  %v3484_v13 = vld [vmem:[#allocation2 + $0xa8] sm:$0xff]  ;;  %v3493_v14 = vld [vmem:[#allocation2 + $0xf0] sm:$0xff]  ;;  %v3467_v15 = vld [vmem:[#allocation2 + $0x20] sm:$0xff]  ;;  %s409_s16 = scalar_lea.vmem %s4165_s10, %s3461_s15 }
  0x17   : > { %v411_v0 = vld [vmem:[%s3916_s18 + $0x8] sm:$0xff]  ;;  %v410_v1 = vld [vmem:[%s3916_s18] sm:$0xff]  ;;  %960 = vmatpush.bf16.msra.mxu1 %v3469_v5  ;;  %v3466_v19 = vld [vmem:[#allocation2 + $0x18] sm:$0xff] }
  0x18   : > { %439 = vmatpush.msra.mxu0 %v411_v0  ;;  %974 = vmatpush.bf16.msra.mxu2 %v3477_v7  ;;  %v3475_v16 = vld [vmem:[#allocation2 + $0x60] sm:$0xff]  ;;  %v3492_v18 = vld [vmem:[#allocation2 + $0xe8] sm:$0xff]  ;;  %v3474_v20 = vld [vmem:[#allocation2 + $0x58] sm:$0xff] }
  0x19   : > { %988 = vmatpush.bf16.msra.mxu3 %v3485_v8  ;;  %v3483_v17 = vld [vmem:[#allocation2 + $0xa0] sm:$0xff]  ;;  %v3937_v21 = vld [vmem:[%s4156_s1 + $0x10] sm:$0xff]  ;;  %v3482_v22 = vld [vmem:[#allocation2 + $0x98] sm:$0xff] }
  0x1a   : > { %440 = vmatpush.msra.mxu0 %v410_v1  ;;  %v3465_v23 = vld [vmem:[#allocation2 + $0x10] sm:$0xff]  ;;  %v3464_v26 = vld [vmem:[#allocation2 + $0x8] sm:$0xff]  ;;  %v3463_v27 = vld [vmem:[#allocation2] sm:$0xff] }
  0x1b   : > { %2706 = vmatmul.msk.f32.vlgmr.msra.gmra.mxu0 %vm415_vm0, %v3923_v2  ;;  %961 = vmatpush.bf16.msra.mxu1 %v3468_v10  ;;  %v3473_v24 = vld [vmem:[#allocation2 + $0x50] sm:$0xff]  ;;  %v3502_v28 = vld [vmem:[#allocation2 + $0x138] sm:$0xff]  ;;  %v3472_v30 = vld [vmem:[#allocation2 + $0x48] sm:$0xff] }
  0x1c   : > { %1001 = vmatpush.bf16.msrb.mxu0 %v3494_v9  ;;  %975 = vmatpush.bf16.msra.mxu2 %v3476_v12  ;;  %v3481_v25 = vld [vmem:[#allocation2 + $0x90] sm:$0xff]  ;;  %v3480_v31 = vld [vmem:[#allocation2 + $0x88] sm:$0xff]  ;;  %v3491_v32 = vld [vmem:[#allocation2 + $0xe0] sm:$0xff] }
  0x1d   : > { %989 = vmatpush.bf16.msra.mxu3 %v3484_v13  ;;  %v3501_v29 = vld [vmem:[#allocation2 + $0x130] sm:$0xff]  ;;  %v3500_v33 = vld [vmem:[#allocation2 + $0x128] sm:$0xff]  ;;  %v3471_v34 = vld [vmem:[#allocation2 + $0x40] sm:$0xff] }
  0x1e   : > { %v3479_v35 = vld [vmem:[#allocation2 + $0x80] sm:$0xff]  ;;  %v3490_v36 = vld [vmem:[#allocation2 + $0xd8] sm:$0xff]  ;;  %v3489_v40 = vld [vmem:[#allocation2 + $0xd0] sm:$0xff] }
  0x1f   : > { %962 = vmatpush.bf16.msra.mxu1 %v3467_v15  ;;  %v3510_v37 = vld [vmem:[#allocation2 + $0x178] sm:$0xff]  ;;  %v3499_v39 = vld [vmem:[#allocation2 + $0x120] sm:$0xff]  ;;  %v3509_v41 = vld [vmem:[#allocation2 + $0x170] sm:$0xff] }
  0x20   : > { %1002 = vmatpush.bf16.msrb.mxu0 %v3493_v14  ;;  %976 = vmatpush.bf16.msra.mxu2 %v3475_v16  ;;  %v3518_v38 = vld [vmem:[#allocation2 + $0x1b8] sm:$0xff]  ;;  %v3517_v42 = vld [vmem:[#allocation2 + $0x1b0] sm:$0xff]  ;;  %v3488_v44 = vld [vmem:[#allocation2 + $0xc8] sm:$0xff] }
  0x21   : > { %990 = vmatpush.bf16.msra.mxu3 %v3483_v17  ;;  %v3498_v43 = vld [vmem:[#allocation2 + $0x118] sm:$0xff]  ;;  %v3508_v45 = vld [vmem:[#allocation2 + $0x168] sm:$0xff]  ;;  %v3497_v47 = vld [vmem:[#allocation2 + $0x110] sm:$0xff] }
  0x22   : > { %v3516_v46 = vld [vmem:[#allocation2 + $0x1a8] sm:$0xff]  ;;  %v3487_v48 = vld [vmem:[#allocation2 + $0xc0] sm:$0xff]  ;;  %v3506_v52 = vld [vmem:[#allocation2 + $0x158] sm:$0xff] }
  0x23   : > { %2707 = vmatmul.msk.f32.gmra.mxu0 %vm415_vm0, %v3930_v11  ;;  %963 = vmatpush.bf16.msra.mxu1 %v3466_v19  ;;  %v3507_v49 = vld [vmem:[#allocation2 + $0x160] sm:$0xff]  ;;  %v3496_v51 = vld [vmem:[#allocation2 + $0x108] sm:$0xff]  ;;  %v3514_v53 = vld [vmem:[#allocation2 + $0x198] sm:$0xff] }
  0x24   : > { %1003 = vmatpush.bf16.msrb.mxu0 %v3492_v18  ;;  %977 = vmatpush.bf16.msra.mxu2 %v3474_v20  ;;  %v3515_v50 = vld [vmem:[#allocation2 + $0x1a0] sm:$0xff]  ;;  %v3505_v55 = vld [vmem:[#allocation2 + $0x150] sm:$0xff]  ;;  %v3504_v57 = vld [vmem:[#allocation2 + $0x148] sm:$0xff] }
  0x25   : > { %991 = vmatpush.bf16.msra.mxu3 %v3482_v22  ;;  %v3495_v54 = vld [vmem:[#allocation2 + $0x100] sm:$0xff]  ;;  %v3513_v56 = vld [vmem:[#allocation2 + $0x190] sm:$0xff]  ;;  %v3512_v58 = vld [vmem:[#allocation2 + $0x188] sm:$0xff] }
  0x26   : > { %v3503_v60 = vld [vmem:[#allocation2 + $0x140] sm:$0xff] }
  0x27   : > { %964 = vmatpush.bf16.msra.mxu1 %v3465_v23  ;;  %v3511_v61 = vld [vmem:[#allocation2 + $0x180] sm:$0xff] }
  0x28   : > { %978 = vmatpush.bf16.msra.mxu2 %v3473_v24  ;;  %1004 = vmatpush.bf16.msrb.mxu0 %v3491_v32 }
  0x29   : > { %992 = vmatpush.bf16.msra.mxu3 %v3481_v25 }
  0x2b   : > { %2708 = vmatmul.msk.f32.gmra.mxu0 %vm415_vm0, %v3937_v21  ;;  %965 = vmatpush.bf16.msra.mxu1 %v3464_v26 }
  0x2c   : > { %979 = vmatpush.bf16.msra.mxu2 %v3472_v30  ;;  %1005 = vmatpush.bf16.msrb.mxu0 %v3490_v36 }
  0x2d   : > { %993 = vmatpush.bf16.msra.mxu3 %v3480_v31 }
  0x2f   : > { %966 = vmatpush.bf16.msra.mxu1 %v3463_v27 }
  0x30   : > { %980 = vmatpush.bf16.msra.mxu2 %v3471_v34  ;;  %1006 = vmatpush.bf16.msrb.mxu0 %v3489_v40 }
  0x31   : > { %994 = vmatpush.bf16.msra.mxu3 %v3479_v35 }
  0x33   : > { %1015 = vmatpush.bf16.msrb.mxu1 %v3502_v28 }
  0x34   : > { %1029 = vmatpush.bf16.msrb.mxu2 %v3510_v37  ;;  %1007 = vmatpush.bf16.msrb.mxu0 %v3488_v44  ;;  %v3688_v44 = vld [vmem:[%s4164_s9] ss:$0 sm:$0xff] }
  0x35   : > { %1043 = vmatpush.bf16.msrb.mxu3 %v3518_v38 }
  0x37   : > { %1016 = vmatpush.bf16.msrb.mxu1 %v3501_v29 }
  0x38   : > { %1030 = vmatpush.bf16.msrb.mxu2 %v3509_v41  ;;  %1008 = vmatpush.bf16.msrb.mxu0 %v3487_v48 }
  0x39   : > { %1044 = vmatpush.bf16.msrb.mxu3 %v3517_v42 }
  0x3b   : > { %1017 = vmatpush.bf16.msrb.mxu1 %v3500_v33 }
  0x3c   : > { %1031 = vmatpush.bf16.msrb.mxu2 %v3508_v45 }
  0x3d   : > { %1045 = vmatpush.bf16.msrb.mxu3 %v3516_v46 }
  0x3f   : > { %1018 = vmatpush.bf16.msrb.mxu1 %v3499_v39 }
  0x40   : > { %1032 = vmatpush.bf16.msrb.mxu2 %v3507_v49 }
  0x41   : > { %1046 = vmatpush.bf16.msrb.mxu3 %v3515_v50 }
  0x43   : > { %1019 = vmatpush.bf16.msrb.mxu1 %v3498_v43 }
  0x44   : > { %1033 = vmatpush.bf16.msrb.mxu2 %v3506_v52 }
  0x45   : > { %1047 = vmatpush.bf16.msrb.mxu3 %v3514_v53 }
  0x47   : > { %1020 = vmatpush.bf16.msrb.mxu1 %v3497_v47 }
  0x48   : > { %1034 = vmatpush.bf16.msrb.mxu2 %v3505_v55 }
  0x49   : > { %1048 = vmatpush.bf16.msrb.mxu3 %v3513_v56 }
  0x4b   : > { %1021 = vmatpush.bf16.msrb.mxu1 %v3496_v51 }
  0x4c   : > { %1035 = vmatpush.bf16.msrb.mxu2 %v3504_v57 }
  0x4d   : > { %1049 = vmatpush.bf16.msrb.mxu3 %v3512_v58 }
  0x4f   : > { %1022 = vmatpush.bf16.msrb.mxu1 %v3495_v54 }
  0x50   : > { %1036 = vmatpush.bf16.msrb.mxu2 %v3503_v60  ;;  %v3534_v60 = vld [vmem:[#allocation4 + $0x78] sm:$0xff] }
  0x51   : > { %1050 = vmatpush.bf16.msrb.mxu3 %v3511_v61  ;;  %v3542_v61 = vld [vmem:[#allocation4 + $0xb8] sm:$0xff] }
  0x98   : > { %v442_v59 = vpop.f32.mrf.mxu0 }
  0x99   : > { %v455_v5 = vrot.slane %v442_v59, 1  ;;  %v463_v6 = vrot.slane %v442_v59, 2  ;;  %v471_v9 = vrot.slane %v442_v59, 3  ;;  %v479_v24 = vrot.slane %v442_v59, 4 }
  0x9a   : > { %v487_v32 = vrot.slane %v442_v59, 5  ;;  %v495_v34 = vrot.slane %v442_v59, 6 }
  0xa0   : > { %v445_v62 = vpop.f32.mrf.mxu0 }
  0xa1   : > { %v502_v63 = vpack.c.bf16 %v445_v62, %v442_v59  ;;  %v456_v0 = vrot.slane %v445_v62, 1  ;;  %v464_v1 = vrot.slane %v445_v62, 2  ;;  %v472_v3 = vrot.slane %v445_v62, 3 }
  0xa2   : > { %v480_v23 = vrot.slane %v445_v62, 4  ;;  %v488_v30 = vrot.slane %v445_v62, 5  ;;  %v496_v31 = vrot.slane %v445_v62, 6  ;;  %v3550_v62 = vld [vmem:[#allocation4 + $0xf8] sm:$0xff] }
  0xa3   : > { %967 = vmatmul.bf16.vlgmr.msra.gmra.mxu1 %v502_v63  ;;  %v457_v12 = vsel %vm454_vm1, %v455_v5, %v456_v0  ;;  %v465_v13 = vsel %vm462_vm2, %v463_v6, %v464_v1  ;;  %v473_v17 = vsel %vm470_vm3, %v471_v9, %v472_v3  ;;  %v3532_v9 = vld [vmem:[#allocation4 + $0x68] sm:$0xff] }
  0xa4   : > { %v481_v26 = vsel %vm478_vm4, %v479_v24, %v480_v23  ;;  %v489_v36 = vsel %vm486_vm5, %v487_v32, %v488_v30  ;;  %v497_v37 = vsel %vm494_vm6, %v495_v34, %v496_v31  ;;  %1395 = vmatpush.bf16.msra.mxu1 %v3534_v60  ;;  %v3523_v24 = vld [vmem:[#allocation4 + $0x20] sm:$0xff]  ;;  %v3530_v32 = vld [vmem:[#allocation4 + $0x58] sm:$0xff] }
  0xa5   : > { %v3546_v34 = vld [vmem:[#allocation4 + $0xd8] sm:$0xff] }
  0xa8   : > { %v448_v4 = vpop.f32.mrf.mxu0 }
  0xa9   : > { %v458_v7 = vrot.slane %v448_v4, 1  ;;  %v466_v8 = vrot.slane %v448_v4, 2  ;;  %v474_v10 = vrot.slane %v448_v4, 3  ;;  %v482_v14 = vrot.slane %v448_v4, 4 }
  0xaa   : > { %v490_v28 = vrot.slane %v448_v4, 5  ;;  %v498_v29 = vrot.slane %v448_v4, 6  ;;  %v3549_v4 = vld [vmem:[#allocation4 + $0xf0] sm:$0xff] }
  0xab   : > { %v459_v15 = vsel %vm454_vm1, %v456_v0, %v458_v7  ;;  %v467_v16 = vsel %vm462_vm2, %v464_v1, %v466_v8  ;;  %v475_v18 = vsel %vm470_vm3, %v472_v3, %v474_v10  ;;  %v483_v25 = vsel %vm478_vm4, %v480_v23, %v482_v14  ;;  %v3533_v0 = vld [vmem:[#allocation4 + $0x70] sm:$0xff]  ;;  %v3540_v10 = vld [vmem:[#allocation4 + $0xa8] sm:$0xff] }
  0xac   : > { %v503_v19 = vpack.c.bf16 %v459_v15, %v457_v12  ;;  %v504_v20 = vpack.c.bf16 %v467_v16, %v465_v13  ;;  %v505_v22 = vpack.c.bf16 %v475_v18, %v473_v17  ;;  %v506_v27 = vpack.c.bf16 %v483_v25, %v481_v26  ;;  %v3541_v1 = vld [vmem:[#allocation4 + $0xb0] sm:$0xff]  ;;  %1396 = vmatpush.bf16.msra.mxu1 %v3533_v0  ;;  %v3548_v13 = vld [vmem:[#allocation4 + $0xe8] sm:$0xff]  ;;  %v1059_v18 = vld [vmem:[%s4157_s2] sm:$0xff] }
  0xad   : > { %v491_v33 = vsel %vm486_vm5, %v488_v30, %v490_v28  ;;  %v499_v35 = vsel %vm494_vm6, %v496_v31, %v498_v29  ;;  %v3524_v23 = vld [vmem:[#allocation4 + $0x28] sm:$0xff]  ;;  %v1061_v25 = vld [vmem:[%s4157_s2 + $0x10] sm:$0xff]  ;;  %v3522_v26 = vld [vmem:[#allocation4 + $0x18] sm:$0xff] }
  0xae   : > { %981 = vmatmul.bf16.vlgmr.msra.gmra.mxu2 %v503_v19  ;;  %995 = vmatmul.bf16.vlgmr.msra.gmra.mxu3 %v504_v20  ;;  %v507_v38 = vpack.c.bf16 %v491_v33, %v489_v36  ;;  %v508_v39 = vpack.c.bf16 %v499_v35, %v497_v37  ;;  %v3526_v19 = vld [vmem:[#allocation4 + $0x38] sm:$0xff]  ;;  %v3525_v20 = vld [vmem:[#allocation4 + $0x30] sm:$0xff]  ;;  %v3531_v28 = vld [vmem:[#allocation4 + $0x60] sm:$0xff] }
  0xaf   : > { %1009 = vmatmul.bf16.vlgmr.msrb.gmra.mxu0 %v505_v22  ;;  %1409 = vmatpush.bf16.msra.mxu2 %v3542_v61  ;;  %v1060_v22 = vld [vmem:[%s4157_s2 + $0x8] sm:$0xff]  ;;  %v3539_v29 = vld [vmem:[#allocation4 + $0xa0] sm:$0xff]  ;;  %v3538_v33 = vld [vmem:[#allocation4 + $0x98] sm:$0xff] }
  0xb0   : > { %1423 = vmatpush.bf16.msra.mxu3 %v3550_v62  ;;  %1397 = vmatpush.bf16.msra.mxu1 %v3532_v9  ;;  %v3547_v30 = vld [vmem:[#allocation4 + $0xe0] sm:$0xff]  ;;  %v3520_v31 = vld [vmem:[#allocation4 + $0x8] sm:$0xff]  ;;  %v3529_v36 = vld [vmem:[#allocation4 + $0x50] sm:$0xff] }
  0xb1   : > { %v3519_v35 = vld [vmem:[#allocation4] sm:$0xff]  ;;  %v3537_v37 = vld [vmem:[#allocation4 + $0x90] sm:$0xff] }
  0xb3   : > { %1023 = vmatmul.bf16.vlgmr.msrb.gmra.mxu1 %v506_v27  ;;  %1410 = vmatpush.bf16.msra.mxu2 %v3541_v1  ;;  %v3521_v27 = vld [vmem:[#allocation4 + $0x10] sm:$0xff] }
  0xb4   : > { %1424 = vmatpush.bf16.msra.mxu3 %v3549_v4  ;;  %1398 = vmatpush.bf16.msra.mxu1 %v3531_v28  ;;  %v3689_v28 = vld [vmem:[%s4164_s9 + $0x1] ss:$0 sm:$0xff] }
  0xb7   : > { %1411 = vmatpush.bf16.msra.mxu2 %v3540_v10 }
  0xb8   : > { %1425 = vmatpush.bf16.msra.mxu3 %v3548_v13  ;;  %1399 = vmatpush.bf16.msra.mxu1 %v3530_v32  ;;  %v3555_v32 = vld [vmem:[%s4162_s7 + $0x20] sm:$0xff] }
  0xbb   : > { %1412 = vmatpush.bf16.msra.mxu2 %v3539_v29  ;;  %v3564_v29 = vld [vmem:[%s4162_s7 + $0x68] sm:$0xff] }
  0xbc   : > { %1426 = vmatpush.bf16.msra.mxu3 %v3547_v30  ;;  %1400 = vmatpush.bf16.msra.mxu1 %v3529_v36  ;;  %v3572_v30 = vld [vmem:[%s4162_s7 + $0xa8] sm:$0xff]  ;;  %v3582_v36 = vld [vmem:[%s4162_s7 + $0xf8] sm:$0xff] }
  0xbe   : > { %1037 = vmatmul.bf16.vlgmr.msrb.gmra.mxu2 %v507_v38  ;;  %1051 = vmatmul.bf16.vlgmr.msrb.gmra.mxu3 %v508_v39  ;;  %v3545_v38 = vld [vmem:[#allocation4 + $0xd0] sm:$0xff]  ;;  %v3528_v39 = vld [vmem:[#allocation4 + $0x48] sm:$0xff] }
  0xbf   : > { %1413 = vmatpush.bf16.msra.mxu2 %v3538_v33 }
  0xc0   : > { %1427 = vmatpush.bf16.msra.mxu3 %v3546_v34  ;;  %1401 = vmatpush.bf16.msra.mxu1 %v3528_v39  ;;  %v3553_v39 = vld [vmem:[%s4162_s7 + $0x10] sm:$0xff] }
  0xc3   : > { %1414 = vmatpush.bf16.msra.mxu2 %v3537_v37  ;;  %v3554_v37 = vld [vmem:[%s4162_s7 + $0x18] sm:$0xff] }
  0xc4   : > { %1428 = vmatpush.bf16.msra.mxu3 %v3545_v38  ;;  %v3581_v38 = vld [vmem:[%s4162_s7 + $0xf0] sm:$0xff] }
 0x120   : > { %v968_v40 = vpop.f32.mrf.mxu1 }
 0x121   : > { %v969_v45 = vadd.f32 %v3688_v44, %v968_v40  ;;  %v3536_v40 = vld [vmem:[#allocation4 + $0x88] sm:$0xff] }
 0x122   : > { %1415 = vmatpush.bf16.msra.mxu2 %v3536_v40  ;;  %v1465_v40 = vld [vmem:[%s4158_s3 + $0x8] sm:$0xff] }
 0x128   : > { %v970_v43 = vpop.f32.mrf.mxu1 }
 0x129   : > { %v971_v49 = vadd.f32 %v3688_v44, %v970_v43  ;;  %v3535_v43 = vld [vmem:[#allocation4 + $0x80] sm:$0xff] }
 0x12a   : > { %v3543_v44 = vld [vmem:[#allocation4 + $0xc0] sm:$0xff]  ;;  %1416 = vmatpush.bf16.msra.mxu2 %v3535_v43 }
 0x12b   : > { %v3551_v43 = vld [vmem:[%s4162_s7] sm:$0xff] }
 0x12c   : > { %v1010_v46 = vpop.f32.mrf.mxu0 }
 0x130   : > { %v1024_v52 = vpop.f32.mrf.mxu1 }
 0x131   : > { %v982_v41 = vpop.f32.mrf.mxu2  ;;  %v996_v42 = vpop.f32.mrf.mxu3 }
 0x132   : > { %v983_v50 = vadd.f32 %v982_v41, %v969_v45  ;;  %v3544_v41 = vld [vmem:[#allocation4 + $0xc8] sm:$0xff] }
 0x133   : > { %1429 = vmatpush.bf16.msra.mxu3 %v3544_v41  ;;  %v3580_v41 = vld [vmem:[%s4162_s7 + $0xe8] sm:$0xff] }
 0x134   : > { %v997_v53 = vadd.f32 %v996_v42, %v983_v50  ;;  %v1012_v58 = vpop.f32.mrf.mxu0  ;;  %v3527_v42 = vld [vmem:[#allocation4 + $0x40] sm:$0xff] }
 0x135   : > { %1402 = vmatpush.bf16.msra.mxu1 %v3527_v42  ;;  %v3552_v42 = vld [vmem:[%s4162_s7 + $0x8] sm:$0xff] }
 0x136   : > { %v1011_v57 = vadd.f32 %v1010_v46, %v997_v53 }
 0x137   : > { %1430 = vmatpush.bf16.msra.mxu3 %v3543_v44  ;;  %v3590_v44 = vld [vmem:[%s4162_s7 + $0x138] sm:$0xff] }
 0x138   : > { %v1025_v63 = vadd.f32 %v1024_v52, %v1011_v57  ;;  %v1026_v3 = vpop.f32.mrf.mxu1 }
 0x139   : > { %v984_v47 = vpop.f32.mrf.mxu2  ;;  %v998_v48 = vpop.f32.mrf.mxu3 }
 0x13a   : > { %v985_v51 = vadd.f32 %v984_v47, %v971_v49 }
 0x13c   : > { %v999_v54 = vadd.f32 %v998_v48, %v985_v51 }
 0x13e   : > { %v1013_v59 = vadd.f32 %v1012_v58, %v999_v54 }
 0x140   : > { %v1027_v6 = vadd.f32 %v1026_v3, %v1013_v59 }
 0x141   : > { %v1038_v55 = vpop.f32.mrf.mxu2  ;;  %v1052_v56 = vpop.f32.mrf.mxu3 }
 0x142   : > { %v1039_v5 = vadd.f32 %v1038_v55, %v1025_v63 }
 0x144   : > { %v1053_v14 = vadd.f32 %v1052_v56, %v1039_v5 }
 0x146   : > { %v1057_v17 = vmax.f32 %v1053_v14, 0.0 }
 0x149   : > { %v1040_v7 = vpop.f32.mrf.mxu2  ;;  %v1054_v12 = vpop.f32.mrf.mxu3 }
 0x14a   : > { %v1041_v8 = vadd.f32 %v1040_v7, %v1027_v6 }
 0x14c   : > { %v1055_v15 = vadd.f32 %v1054_v12, %v1041_v8 }
 0x14e   : > { %v1058_v16 = vmax.f32 %v1055_v15, 0.0 }
 0x150   : > { %1085 = vmatpush.msra.mxu0 %v1058_v16 }
 0x152   : > { %1086 = vmatpush.msra.mxu0 %v1057_v17 }
 0x153   : > { %2933 = vmatmul.msk.f32.vlgmr.msra.gmra.mxu0 %vm415_vm0, %v1059_v18 }
 0x154   : > { %1381 = vmatpush.bf16.msrb.mxu0 %v3526_v19  ;;  %v1437_v19 = vld [vmem:[%s4159_s4] sm:$0xff] }
 0x158   : > { %1382 = vmatpush.bf16.msrb.mxu0 %v3525_v20  ;;  %v3558_v20 = vld [vmem:[%s4162_s7 + $0x38] sm:$0xff] }
 0x159   : > { %1861 = vmatpush.bf16.msrb.mxu1 %v3558_v20 }
 0x15b   : > { %2934 = vmatmul.msk.f32.gmra.mxu0 %vm415_vm0, %v1060_v22  ;;  %v3557_v22 = vld [vmem:[%s4162_s7 + $0x30] sm:$0xff] }
 0x15c   : > { %1383 = vmatpush.bf16.msrb.mxu0 %v3524_v23  ;;  %v3566_v23 = vld [vmem:[%s4162_s7 + $0x78] sm:$0xff] }
 0x15d   : > { %1875 = vmatpush.bf16.msrb.mxu2 %v3566_v23  ;;  %1862 = vmatpush.bf16.msrb.mxu1 %v3557_v22 }
 0x160   : > { %1384 = vmatpush.bf16.msrb.mxu0 %v3523_v24  ;;  %v3574_v24 = vld [vmem:[%s4162_s7 + $0xb8] sm:$0xff] }
 0x161   : > { %1889 = vmatpush.bf16.msrb.mxu3 %v3574_v24 }
 0x163   : > { %2935 = vmatmul.msk.f32.gmra.mxu0 %vm415_vm0, %v1061_v25  ;;  %v3565_v25 = vld [vmem:[%s4162_s7 + $0x70] sm:$0xff] }
 0x164   : > { %1385 = vmatpush.bf16.msrb.mxu0 %v3522_v26  ;;  %v3573_v26 = vld [vmem:[%s4162_s7 + $0xb0] sm:$0xff]  ;;  %1876 = vmatpush.bf16.msrb.mxu2 %v3565_v25 }
 0x165   : > { %1890 = vmatpush.bf16.msrb.mxu3 %v3573_v26 }
 0x168   : > { %1386 = vmatpush.bf16.msrb.mxu0 %v3521_v27  ;;  %v3556_v27 = vld [vmem:[%s4162_s7 + $0x28] sm:$0xff]  ;;  %1877 = vmatpush.bf16.msrb.mxu2 %v3564_v29 }
 0x169   : > { %1863 = vmatpush.bf16.msrb.mxu1 %v3556_v27  ;;  %1891 = vmatpush.bf16.msrb.mxu3 %v3572_v30 }
 0x16c   : > { %1387 = vmatpush.bf16.msrb.mxu0 %v3520_v31 }
 0x16d   : > { %1864 = vmatpush.bf16.msrb.mxu1 %v3555_v32 }
 0x170   : > { %1388 = vmatpush.bf16.msrb.mxu0 %v3519_v35  ;;  %v1464_v35 = vld [vmem:[%s4158_s3] sm:$0xff] }
 0x171   : > { %1865 = vmatpush.bf16.msrb.mxu1 %v3554_v37  ;;  %v3690_v37 = vld [vmem:[%s4164_s9 + $0x2] ss:$0 sm:$0xff] }
 0x175   : > { %1866 = vmatpush.bf16.msrb.mxu1 %v3553_v39 }
 0x179   : > { %1867 = vmatpush.bf16.msrb.mxu1 %v3552_v42 }
 0x17d   : > { %1868 = vmatpush.bf16.msrb.mxu1 %v3551_v43 }
 0x1d0   : > { %v1088_v45 = vpop.f32.mrf.mxu0 }
 0x1d1   : > { %v1100_v51 = vrot.slane %v1088_v45, 1  ;;  %v1107_v52 = vrot.slane %v1088_v45, 2  ;;  %v1114_v54 = vrot.slane %v1088_v45, 3 }
 0x1d8   : > { %v1091_v46 = vpop.f32.mrf.mxu0 }
 0x1d9   : > { %v1121_v47 = vpack.c.bf16 %v1091_v46, %v1088_v45  ;;  %v1101_v48 = vrot.slane %v1091_v46, 1  ;;  %v1108_v49 = vrot.slane %v1091_v46, 2  ;;  %v1115_v50 = vrot.slane %v1091_v46, 3  ;;  %v1466_v45 = vld [vmem:[%s4158_s3 + $0x10] sm:$0xff] }
 0x1da   : > { %v3589_v46 = vld [vmem:[%s4162_s7 + $0x130] sm:$0xff] }
 0x1db   : > { %1389 = vmatmul.bf16.vlgmr.msrb.gmra.mxu0 %v1121_v47  ;;  %v1102_v58 = vsel %vm454_vm1, %v1100_v51, %v1101_v48  ;;  %v1109_v59 = vsel %vm462_vm2, %v1107_v52, %v1108_v49  ;;  %v1116_v63 = vsel %vm470_vm3, %v1114_v54, %v1115_v50  ;;  %v3563_v47 = vld [vmem:[%s4162_s7 + $0x60] sm:$0xff]  ;;  %v3562_v51 = vld [vmem:[%s4162_s7 + $0x58] sm:$0xff] }
 0x1dc   : > { %1878 = vmatpush.bf16.msrb.mxu2 %v3563_v47  ;;  %v3570_v52 = vld [vmem:[%s4162_s7 + $0x98] sm:$0xff]  ;;  %v3587_v54 = vld [vmem:[%s4162_s7 + $0x120] sm:$0xff] }
 0x1dd   : > { %v3606_v47 = vld [vmem:[#allocation6 + $0x78] sm:$0xff] }
 0x1e0   : > { %v1094_v53 = vpop.f32.mrf.mxu0  ;;  %1879 = vmatpush.bf16.msrb.mxu2 %v3562_v51  ;;  %v3605_v51 = vld [vmem:[#allocation6 + $0x70] sm:$0xff] }
 0x1e1   : > { %v1103_v55 = vrot.slane %v1094_v53, 1  ;;  %v1110_v56 = vrot.slane %v1094_v53, 2  ;;  %v1117_v57 = vrot.slane %v1094_v53, 3  ;;  %v3578_v53 = vld [vmem:[%s4162_s7 + $0xd8] sm:$0xff] }
 0x1e3   : > { %v1104_v60 = vsel %vm454_vm1, %v1101_v48, %v1103_v55  ;;  %v1111_v61 = vsel %vm462_vm2, %v1108_v49, %v1110_v56  ;;  %v1118_v62 = vsel %vm470_vm3, %v1115_v50, %v1117_v57  ;;  %v3571_v48 = vld [vmem:[%s4162_s7 + $0xa0] sm:$0xff]  ;;  %v3588_v50 = vld [vmem:[%s4162_s7 + $0x128] sm:$0xff]  ;;  %v3561_v55 = vld [vmem:[%s4162_s7 + $0x50] sm:$0xff] }
 0x1e4   : > { %v1122_v0 = vpack.c.bf16 %v1104_v60, %v1102_v58  ;;  %v1123_v1 = vpack.c.bf16 %v1111_v61, %v1109_v59  ;;  %v1124_v3 = vpack.c.bf16 %v1118_v62, %v1116_v63  ;;  %v3579_v49 = vld [vmem:[%s4162_s7 + $0xe0] sm:$0xff]  ;;  %1892 = vmatpush.bf16.msrb.mxu3 %v3571_v48  ;;  %v3569_v56 = vld [vmem:[%s4162_s7 + $0x90] sm:$0xff]  ;;  %v3586_v58 = vld [vmem:[%s4162_s7 + $0x118] sm:$0xff]  ;;  %1880 = vmatpush.bf16.msrb.mxu2 %v3561_v55 }
 0x1e5   : > { %v3577_v57 = vld [vmem:[%s4162_s7 + $0xd0] sm:$0xff]  ;;  %v3560_v59 = vld [vmem:[%s4162_s7 + $0x48] sm:$0xff]  ;;  %v3559_v63 = vld [vmem:[%s4162_s7 + $0x40] sm:$0xff] }
 0x1e6   : > { %1403 = vmatmul.bf16.vlgmr.msra.gmra.mxu1 %v1122_v0  ;;  %1417 = vmatmul.bf16.vlgmr.msra.gmra.mxu2 %v1123_v1  ;;  %v3568_v60 = vld [vmem:[%s4162_s7 + $0x88] sm:$0xff]  ;;  %v3585_v62 = vld [vmem:[%s4162_s7 + $0x110] sm:$0xff]  ;;  %v3567_v0 = vld [vmem:[%s4162_s7 + $0x80] sm:$0xff] }
 0x1e7   : > { %1431 = vmatmul.bf16.vlgmr.msra.gmra.mxu3 %v1124_v3  ;;  %1917 = vmatpush.bf16.msra.mxu1 %v3590_v44  ;;  %v3576_v61 = vld [vmem:[%s4162_s7 + $0xc8] sm:$0xff]  ;;  %v3575_v1 = vld [vmem:[%s4162_s7 + $0xc0] sm:$0xff]  ;;  %v3598_v44 = vld [vmem:[#allocation6 + $0x38] sm:$0xff] }
 0x1e8   : > { %1893 = vmatpush.bf16.msrb.mxu3 %v3570_v52  ;;  %1881 = vmatpush.bf16.msrb.mxu2 %v3560_v59  ;;  %v3584_v3 = vld [vmem:[%s4162_s7 + $0x108] sm:$0xff]  ;;  %v3622_v55 = vld [vmem:[#allocation6 + $0xf8] sm:$0xff] }
 0x1e9   : > { %v3604_v59 = vld [vmem:[#allocation6 + $0x68] sm:$0xff] }
 0x1eb   : > { %1918 = vmatpush.bf16.msra.mxu1 %v3589_v46 }
 0x1ec   : > { %1894 = vmatpush.bf16.msrb.mxu3 %v3569_v56  ;;  %1882 = vmatpush.bf16.msrb.mxu2 %v3559_v63 }
 0x1ef   : > { %1919 = vmatpush.bf16.msra.mxu1 %v3588_v50 }
 0x1f0   : > { %1895 = vmatpush.bf16.msrb.mxu3 %v3568_v60  ;;  %v3621_v60 = vld [vmem:[#allocation6 + $0xf0] sm:$0xff] }
 0x1f3   : > { %1920 = vmatpush.bf16.msra.mxu1 %v3587_v54 }
 0x1f4   : > { %1896 = vmatpush.bf16.msrb.mxu3 %v3567_v0  ;;  %v3595_v0 = vld [vmem:[#allocation6 + $0x20] sm:$0xff] }
 0x1f7   : > { %1921 = vmatpush.bf16.msra.mxu1 %v3586_v58 }
 0x1f8   : > { %2461 = vmatpush.bf16.msra.mxu3 %v3598_v44  ;;  %v3633_v44 = vld [vmem:[#allocation6 + $0x150] sm:$0xff] }
 0x1fb   : > { %1922 = vmatpush.bf16.msra.mxu1 %v3585_v62 }
 0x1ff   : > { %1923 = vmatpush.bf16.msra.mxu1 %v3584_v3  ;;  %v3603_v3 = vld [vmem:[#allocation6 + $0x60] sm:$0xff] }
 0x258   : > { %v1390_v5 = vpop.f32.mrf.mxu0 }
 0x260   : > { %v1392_v9 = vpop.f32.mrf.mxu0 }
 0x263   : > { %v1404_v4 = vpop.f32.mrf.mxu1 }
 0x264   : > { %v1405_v10 = vadd.f32 %v1404_v4, %v1390_v5  ;;  %v3583_v4 = vld [vmem:[%s4162_s7 + $0x100] sm:$0xff] }
 0x265   : > { %1924 = vmatpush.bf16.msra.mxu1 %v3583_v4  ;;  %v3620_v4 = vld [vmem:[#allocation6 + $0xe8] sm:$0xff] }
 0x269   : > { %v1418_v6 = vpop.f32.mrf.mxu2 }
 0x26a   : > { %v1432_v7 = vpop.f32.mrf.mxu3  ;;  %v1419_v14 = vadd.f32 %v1418_v6, %v1405_v10 }
 0x26b   : > { %v1406_v8 = vpop.f32.mrf.mxu1 }
 0x26c   : > { %v1407_v12 = vadd.f32 %v1406_v8, %v1392_v9  ;;  %v1433_v18 = vadd.f32 %v1432_v7, %v1419_v14 }
 0x271   : > { %v1420_v13 = vpop.f32.mrf.mxu2 }
 0x272   : > { %v1421_v15 = vadd.f32 %v1420_v13, %v1407_v12  ;;  %v1434_v16 = vpop.f32.mrf.mxu3 }
 0x274   : > { %v1435_v17 = vadd.f32 %v1434_v16, %v1421_v15 }
 0x276   : > { %1457 = vmatpush.msra.mxu0 %v1435_v17 }
 0x278   : > { %1458 = vmatpush.msra.mxu0 %v1433_v18 }
 0x279   : > { %3064 = vmatmul.msk.f32.vlgmr.msra.gmra.mxu0 %vm415_vm0, %v1437_v19 }
 0x2f6   : > { %v1460_v31 = vpop.f32.mrf.mxu0 }
 0x2f7   : > { %v1461_v33 = vadd.f32 %v3689_v28, %v1460_v31 }
 0x2f9   : > { %v1463_v34 = vmax.f32 %v1461_v33, 0.0 }
 0x2fb   : > { %1492 = vmatpush.msrb.mxu0 %v1463_v34 }
 0x2fc   : > { %3065 = vmatmul.msk.f32.vlgmr.msrb.gmra.mxu0 %vm1467_vm7, %v1464_v35 }
 0x2fd   : > { %1903 = vmatpush.bf16.msra.mxu0 %v3582_v36 }
 0x301   : > { %1904 = vmatpush.bf16.msra.mxu0 %v3581_v38 }
 0x304   : > { %3066 = vmatmul.msk.f32.gmra.mxu0 %vm1467_vm7, %v1465_v40 }
 0x305   : > { %1905 = vmatpush.bf16.msra.mxu0 %v3580_v41 }
 0x309   : > { %1906 = vmatpush.bf16.msra.mxu0 %v3579_v49  ;;  %v3597_v49 = vld [vmem:[#allocation6 + $0x30] sm:$0xff] }
 0x30a   : > { %2462 = vmatpush.bf16.msra.mxu3 %v3597_v49  ;;  %v3631_v49 = vld [vmem:[#allocation6 + $0x140] sm:$0xff] }
 0x30c   : > { %3067 = vmatmul.msk.f32.gmra.mxu0 %vm1467_vm7, %v1466_v45 }
 0x30d   : > { %1907 = vmatpush.bf16.msra.mxu0 %v3578_v53 }
 0x311   : > { %1908 = vmatpush.bf16.msra.mxu0 %v3577_v57  ;;  %v3596_v57 = vld [vmem:[#allocation6 + $0x28] sm:$0xff] }
 0x312   : > { %2463 = vmatpush.bf16.msra.mxu3 %v3596_v57 }
 0x315   : > { %1909 = vmatpush.bf16.msra.mxu0 %v3576_v61 }
 0x316   : > { %2464 = vmatpush.bf16.msra.mxu3 %v3595_v0 }
 0x319   : > { %1910 = vmatpush.bf16.msra.mxu0 %v3575_v1 }
 0x31d   : > { %2475 = vmatpush.bf16.msrb.mxu0 %v3606_v47  ;;  %v3640_v47 = vld [vmem:[#allocation6 + $0x188] sm:$0xff] }
 0x321   : > { %2476 = vmatpush.bf16.msrb.mxu0 %v3605_v51 }
 0x325   : > { %2477 = vmatpush.bf16.msrb.mxu0 %v3604_v59 }
 0x329   : > { %2478 = vmatpush.bf16.msrb.mxu0 %v3603_v3 }
 0x379   : > { %v1494_v5 = vpop.f32.mrf.mxu0 }
 0x37a   : > { %v1506_v12 = vrot.slane %v1494_v5, 1  ;;  %v1513_v13 = vrot.slane %v1494_v5, 2  ;;  %v1520_v14 = vrot.slane %v1494_v5, 3  ;;  %v1527_v31 = vrot.slane %v1494_v5, 4 }
 0x381   : > { %v1497_v6 = vpop.f32.mrf.mxu0 }
 0x382   : > { %v1534_v7 = vpack.c.bf16 %v1497_v6, %v1494_v5  ;;  %v1507_v8 = vrot.slane %v1497_v6, 1  ;;  %v1514_v9 = vrot.slane %v1497_v6, 2  ;;  %v1521_v10 = vrot.slane %v1497_v6, 3 }
 0x383   : > { %v1528_v30 = vrot.slane %v1497_v6, 4  ;;  %v3614_v6 = vld [vmem:[#allocation6 + $0xb8] sm:$0xff] }
 0x384   : > { %1869 = vmatmul.bf16.vlgmr.msrb.gmra.mxu1 %v1534_v7  ;;  %v1508_v19 = vsel %vm454_vm1, %v1506_v12, %v1507_v8  ;;  %v1515_v20 = vsel %vm462_vm2, %v1513_v13, %v1514_v9  ;;  %v1522_v22 = vsel %vm470_vm3, %v1520_v14, %v1521_v10  ;;  %v3594_v7 = vld [vmem:[#allocation6 + $0x18] sm:$0xff]  ;;  %v3601_v12 = vld [vmem:[#allocation6 + $0x50] sm:$0xff]  ;;  %v3612_v13 = vld [vmem:[#allocation6 + $0xa8] sm:$0xff] }
 0x385   : > { %v1529_v33 = vsel %vm478_vm4, %v1527_v31, %v1528_v30  ;;  %2503 = vmatpush.bf16.msrb.mxu1 %v3622_v55  ;;  %2465 = vmatpush.bf16.msra.mxu3 %v3594_v7  ;;  %v3592_v14 = vld [vmem:[#allocation6 + $0x8] sm:$0xff]  ;;  %v3645_v31 = vld [vmem:[#allocation6 + $0x1b0] sm:$0xff] }
 0x389   : > { %v1500_v15 = vpop.f32.mrf.mxu0  ;;  %2504 = vmatpush.bf16.msrb.mxu1 %v3621_v60 }
 0x38a   : > { %v1509_v16 = vrot.slane %v1500_v15, 1  ;;  %v1516_v17 = vrot.slane %v1500_v15, 2  ;;  %v1523_v18 = vrot.slane %v1500_v15, 3  ;;  %v1530_v23 = vrot.slane %v1500_v15, 4  ;;  %v3611_v15 = vld [vmem:[#allocation6 + $0xa0] sm:$0xff] }
 0x38c   : > { %v1510_v24 = vsel %vm454_vm1, %v1507_v8, %v1509_v16  ;;  %v1517_v25 = vsel %vm462_vm2, %v1514_v9, %v1516_v17  ;;  %v1524_v26 = vsel %vm470_vm3, %v1521_v10, %v1523_v18  ;;  %v1531_v32 = vsel %vm478_vm4, %v1528_v30, %v1530_v23  ;;  %v3602_v8 = vld [vmem:[#allocation6 + $0x58] sm:$0xff]  ;;  %v3613_v9 = vld [vmem:[#allocation6 + $0xb0] sm:$0xff]  ;;  %v3591_v16 = vld [vmem:[#allocation6] sm:$0xff] }
 0x38d   : > { %v1535_v27 = vpack.c.bf16 %v1510_v24, %v1508_v19  ;;  %v1536_v28 = vpack.c.bf16 %v1517_v25, %v1515_v20  ;;  %v1537_v29 = vpack.c.bf16 %v1524_v26, %v1522_v22  ;;  %v1538_v34 = vpack.c.bf16 %v1531_v32, %v1529_v33  ;;  %2505 = vmatpush.bf16.msrb.mxu1 %v3620_v4  ;;  %v3593_v10 = vld [vmem:[#allocation6 + $0x10] sm:$0xff]  ;;  %v3610_v17 = vld [vmem:[#allocation6 + $0x98] sm:$0xff]  ;;  %v3600_v20 = vld [vmem:[#allocation6 + $0x48] sm:$0xff] }
 0x38e   : > { %2479 = vmatpush.bf16.msrb.mxu0 %v3602_v8  ;;  %2466 = vmatpush.bf16.msra.mxu3 %v3593_v10  ;;  %v3609_v18 = vld [vmem:[#allocation6 + $0x90] sm:$0xff]  ;;  %v3608_v22 = vld [vmem:[#allocation6 + $0x88] sm:$0xff]  ;;  %v3619_v23 = vld [vmem:[#allocation6 + $0xe0] sm:$0xff] }
 0x38f   : > { %1883 = vmatmul.bf16.vlgmr.msrb.gmra.mxu2 %v1535_v27  ;;  %1897 = vmatmul.bf16.vlgmr.msrb.gmra.mxu3 %v1536_v28  ;;  %v3629_v19 = vld [vmem:[#allocation6 + $0x130] sm:$0xff]  ;;  %v3599_v24 = vld [vmem:[#allocation6 + $0x40] sm:$0xff]  ;;  %v3618_v26 = vld [vmem:[#allocation6 + $0xd8] sm:$0xff] }
 0x390   : > { %1911 = vmatmul.bf16.vlgmr.msra.gmra.mxu0 %v1537_v29  ;;  %v3607_v25 = vld [vmem:[#allocation6 + $0x80] sm:$0xff]  ;;  %v3638_v27 = vld [vmem:[#allocation6 + $0x178] sm:$0xff]  ;;  %v3617_v29 = vld [vmem:[#allocation6 + $0xd0] sm:$0xff] }
 0x391   : > { %2506 = vmatpush.bf16.msrb.mxu1 %v3619_v23  ;;  %v3646_v28 = vld [vmem:[#allocation6 + $0x1b8] sm:$0xff]  ;;  %v3637_v30 = vld [vmem:[#allocation6 + $0x170] sm:$0xff]  ;;  %v3616_v33 = vld [vmem:[#allocation6 + $0xc8] sm:$0xff] }
 0x392   : > { %2480 = vmatpush.bf16.msrb.mxu0 %v3601_v12  ;;  %2467 = vmatpush.bf16.msra.mxu3 %v3592_v14  ;;  %v3626_v32 = vld [vmem:[#allocation6 + $0x118] sm:$0xff] }
 0x394   : > { %1925 = vmatmul.bf16.vlgmr.msra.gmra.mxu1 %v1538_v34  ;;  %v3636_v34 = vld [vmem:[#allocation6 + $0x168] sm:$0xff] }
 0x395   : > { %2507 = vmatpush.bf16.msrb.mxu1 %v3618_v26 }
 0x396   : > { %2468 = vmatpush.bf16.msra.mxu3 %v3591_v16  ;;  %2481 = vmatpush.bf16.msrb.mxu0 %v3600_v20 }
 0x399   : > { %2508 = vmatpush.bf16.msrb.mxu1 %v3617_v29 }
 0x39a   : > { %2482 = vmatpush.bf16.msrb.mxu0 %v3599_v24 }
 0x39d   : > { %2509 = vmatpush.bf16.msrb.mxu1 %v3616_v33 }
 0x39e   : > { %2531 = vmatpush.bf16.msra.mxu0 %v3638_v27 }
 0x3a2   : > { %2532 = vmatpush.bf16.msra.mxu0 %v3637_v30 }
 0x3a6   : > { %2533 = vmatpush.bf16.msra.mxu0 %v3636_v34 }
 0x401   : > { %v1870_v35 = vpop.f32.mrf.mxu1 }
 0x402   : > { %v1871_v39 = vadd.f32 %v3690_v37, %v1870_v35  ;;  %v3644_v35 = vld [vmem:[#allocation6 + $0x1a8] sm:$0xff] }
 0x409   : > { %v1872_v36 = vpop.f32.mrf.mxu1 }
 0x40a   : > { %v1873_v45 = vadd.f32 %v3690_v37, %v1872_v36  ;;  %v3625_v36 = vld [vmem:[#allocation6 + $0x110] sm:$0xff]  ;;  %v3615_v37 = vld [vmem:[#allocation6 + $0xc0] sm:$0xff] }
 0x40b   : > { %2510 = vmatpush.bf16.msrb.mxu1 %v3615_v37 }
 0x40d   : > { %v1912_v41 = vpop.f32.mrf.mxu0 }
 0x411   : > { %v1926_v43 = vpop.f32.mrf.mxu1 }
 0x412   : > { %v1884_v38 = vpop.f32.mrf.mxu2  ;;  %v1898_v40 = vpop.f32.mrf.mxu3 }
 0x413   : > { %v1885_v42 = vadd.f32 %v1884_v38, %v1871_v39  ;;  %v3635_v38 = vld [vmem:[#allocation6 + $0x160] sm:$0xff] }
 0x414   : > { %v3643_v39 = vld [vmem:[#allocation6 + $0x1a0] sm:$0xff]  ;;  %2534 = vmatpush.bf16.msra.mxu0 %v3635_v38 }
 0x415   : > { %v1899_v46 = vadd.f32 %v1898_v40, %v1885_v42  ;;  %v1914_v56 = vpop.f32.mrf.mxu0  ;;  %v3624_v40 = vld [vmem:[#allocation6 + $0x108] sm:$0xff]  ;;  %v3642_v42 = vld [vmem:[#allocation6 + $0x198] sm:$0xff] }
 0x417   : > { %v1913_v53 = vadd.f32 %v1912_v41, %v1899_v46  ;;  %v3634_v41 = vld [vmem:[#allocation6 + $0x158] sm:$0xff]  ;;  %v3632_v46 = vld [vmem:[#allocation6 + $0x148] sm:$0xff] }
 0x418   : > { %2535 = vmatpush.bf16.msra.mxu0 %v3634_v41 }
 0x419   : > { %v1928_v61 = vpop.f32.mrf.mxu1  ;;  %v1927_v63 = vadd.f32 %v1926_v43, %v1913_v53  ;;  %v3623_v43 = vld [vmem:[#allocation6 + $0x100] sm:$0xff] }
 0x41a   : > { %v1886_v48 = vpop.f32.mrf.mxu2  ;;  %v1900_v52 = vpop.f32.mrf.mxu3 }
 0x41b   : > { %v1887_v50 = vadd.f32 %v1886_v48, %v1873_v45  ;;  %v1931_v5 = vmax.f32 %v1927_v63, 0.0  ;;  %v3641_v45 = vld [vmem:[#allocation6 + $0x190] sm:$0xff] }
 0x41c   : > { %2536 = vmatpush.bf16.msra.mxu0 %v3633_v44 }
 0x41d   : > { %v1901_v54 = vadd.f32 %v1900_v52, %v1887_v50  ;;  %v3639_v50 = vld [vmem:[#allocation6 + $0x180] sm:$0xff] }
 0x41f   : > { %v1915_v58 = vadd.f32 %v1914_v56, %v1901_v54 }
 0x420   : > { %2537 = vmatpush.bf16.msra.mxu0 %v3632_v46 }
 0x421   : > { %v1929_v62 = vadd.f32 %v1928_v61, %v1915_v58 }
 0x423   : > { %v1932_v1 = vmax.f32 %v1929_v62, 0.0 }
 0x424   : > { %2538 = vmatpush.bf16.msra.mxu0 %v3631_v49 }
 0x425   : > { %1947 = vmatpush.msra.mxu2 %v1932_v1 }
 0x427   : > { %1948 = vmatpush.msra.mxu2 %v1931_v5 }
 0x428   : > { %3228 = vmatmul.msk.f32.vlgmr.msra.gmra.mxu2 %vm415_vm0, %v3923_v2  ;;  %v3630_v2 = vld [vmem:[#allocation6 + $0x138] sm:$0xff] }
 0x429   : > { %2489 = vmatpush.bf16.msrb.mxu2 %v3614_v6  ;;  %2517 = vmatpush.bf16.msrb.mxu3 %v3630_v2 }
 0x42d   : > { %2490 = vmatpush.bf16.msrb.mxu2 %v3613_v9  ;;  %2518 = vmatpush.bf16.msrb.mxu3 %v3629_v19 }
 0x430   : > { %3229 = vmatmul.msk.f32.gmra.mxu2 %vm415_vm0, %v3930_v11  ;;  %v3628_v11 = vld [vmem:[#allocation6 + $0x128] sm:$0xff] }
 0x431   : > { %2491 = vmatpush.bf16.msrb.mxu2 %v3612_v13  ;;  %2519 = vmatpush.bf16.msrb.mxu3 %v3628_v11 }
 0x435   : > { %2492 = vmatpush.bf16.msrb.mxu2 %v3611_v15 }
 0x438   : > { %3230 = vmatmul.msk.f32.gmra.mxu2 %vm415_vm0, %v3937_v21  ;;  %v3627_v21 = vld [vmem:[#allocation6 + $0x120] sm:$0xff] }
 0x439   : > { %2493 = vmatpush.bf16.msrb.mxu2 %v3610_v17  ;;  %2520 = vmatpush.bf16.msrb.mxu3 %v3627_v21  ;;  %v3691_v21 = vld [vmem:[%s4164_s9 + $0x3] ss:$0 sm:$0xff] }
 0x43d   : > { %2494 = vmatpush.bf16.msrb.mxu2 %v3609_v18  ;;  %2521 = vmatpush.bf16.msrb.mxu3 %v3626_v32 }
 0x441   : > { %2495 = vmatpush.bf16.msrb.mxu2 %v3608_v22  ;;  %2522 = vmatpush.bf16.msrb.mxu3 %v3625_v36 }
 0x445   : > { %2496 = vmatpush.bf16.msrb.mxu2 %v3607_v25  ;;  %2523 = vmatpush.bf16.msrb.mxu3 %v3624_v40 }
 0x449   : > { %2545 = vmatpush.bf16.msra.mxu2 %v3646_v28  ;;  %2524 = vmatpush.bf16.msrb.mxu3 %v3623_v43 }
 0x44d   : > { %2546 = vmatpush.bf16.msra.mxu2 %v3645_v31 }
 0x451   : > { %2547 = vmatpush.bf16.msra.mxu2 %v3644_v35 }
 0x455   : > { %2548 = vmatpush.bf16.msra.mxu2 %v3643_v39 }
 0x459   : > { %2549 = vmatpush.bf16.msra.mxu2 %v3642_v42 }
 0x45d   : > { %2550 = vmatpush.bf16.msra.mxu2 %v3641_v45 }
 0x461   : > { %2551 = vmatpush.bf16.msra.mxu2 %v3640_v47 }
 0x465   : > { %2552 = vmatpush.bf16.msra.mxu2 %v3639_v50 }
 0x4ab   : > { %v1950_v48 = vpop.f32.mrf.mxu2 }
 0x4ac   : > { %v1962_v57 = vrot.slane %v1950_v48, 1  ;;  %v1969_v58 = vrot.slane %v1950_v48, 2  ;;  %v1976_v62 = vrot.slane %v1950_v48, 3  ;;  %v1983_v12 = vrot.slane %v1950_v48, 4 }
 0x4ad   : > { %v1990_v19 = vrot.slane %v1950_v48, 5  ;;  %v1997_v22 = vrot.slane %v1950_v48, 6 }
 0x4b3   : > { %v1953_v51 = vpop.f32.mrf.mxu2 }
 0x4b4   : > { %v2004_v52 = vpack.c.bf16 %v1953_v51, %v1950_v48  ;;  %v1963_v53 = vrot.slane %v1953_v51, 1  ;;  %v1970_v54 = vrot.slane %v1953_v51, 2  ;;  %v1977_v55 = vrot.slane %v1953_v51, 3 }
 0x4b5   : > { %v1984_v10 = vrot.slane %v1953_v51, 4  ;;  %v1991_v17 = vrot.slane %v1953_v51, 5  ;;  %v1998_v18 = vrot.slane %v1953_v51, 6 }
 0x4b6   : > { %2469 = vmatmul.bf16.vlgmr.msra.gmra.mxu3 %v2004_v52  ;;  %v1964_v0 = vsel %vm454_vm1, %v1962_v57, %v1963_v53  ;;  %v1971_v1 = vsel %vm462_vm2, %v1969_v58, %v1970_v54  ;;  %v1978_v5 = vsel %vm470_vm3, %v1976_v62, %v1977_v55 }
 0x4b7   : > { %v1985_v14 = vsel %vm478_vm4, %v1983_v12, %v1984_v10  ;;  %v1992_v11 = vsel %vm486_vm5, %v1990_v19, %v1991_v17  ;;  %v1999_v24 = vsel %vm494_vm6, %v1997_v22, %v1998_v18 }
 0x4bb   : > { %v1956_v56 = vpop.f32.mrf.mxu2 }
 0x4bc   : > { %v1965_v59 = vrot.slane %v1956_v56, 1  ;;  %v1972_v60 = vrot.slane %v1956_v56, 2  ;;  %v1979_v61 = vrot.slane %v1956_v56, 3  ;;  %v1986_v63 = vrot.slane %v1956_v56, 4 }
 0x4bd   : > { %v1993_v16 = vrot.slane %v1956_v56, 5  ;;  %v2000_v2 = vrot.slane %v1956_v56, 6 }
 0x4be   : > { %v1966_v3 = vsel %vm454_vm1, %v1963_v53, %v1965_v59  ;;  %v1973_v4 = vsel %vm462_vm2, %v1970_v54, %v1972_v60  ;;  %v1980_v6 = vsel %vm470_vm3, %v1977_v55, %v1979_v61  ;;  %v1987_v13 = vsel %vm478_vm4, %v1984_v10, %v1986_v63  ;;  %v3700_v10 = vld [vmem:[%s3916_s18] sm:$0xff] }
 0x4bf   : > { %v2005_v7 = vpack.c.bf16 %v1966_v3, %v1964_v0  ;;  %v2006_v8 = vpack.c.bf16 %v1973_v4, %v1971_v1  ;;  %v2007_v9 = vpack.c.bf16 %v1980_v6, %v1978_v5  ;;  %v2008_v15 = vpack.c.bf16 %v1987_v13, %v1985_v14 }
 0x4c0   : > { %v1994_v20 = vsel %vm486_vm5, %v1991_v17, %v1993_v16  ;;  %v2001_v23 = vsel %vm494_vm6, %v1998_v18, %v2000_v2 }
 0x4c1   : > { %2483 = vmatmul.bf16.vlgmr.msrb.gmra.mxu0 %v2005_v7  ;;  %2497 = vmatmul.bf16.vlgmr.msrb.gmra.mxu2 %v2006_v8  ;;  %v2009_v25 = vpack.c.bf16 %v1994_v20, %v1992_v11  ;;  %v2010_v26 = vpack.c.bf16 %v2001_v23, %v1999_v24  ;;  %v3701_v23 = vld [vmem:[%s3916_s18 + $0x8] sm:$0xff] }
 0x4c2   : > { %2511 = vmatmul.bf16.vlgmr.msrb.gmra.mxu1 %v2007_v9 }
 0x4c6   : > { %2525 = vmatmul.bf16.vlgmr.msrb.gmra.mxu3 %v2008_v15 }
 0x4d1   : > { %2539 = vmatmul.bf16.vlgmr.msra.gmra.mxu0 %v2009_v25  ;;  %2553 = vmatmul.bf16.vlgmr.msra.gmra.mxu2 %v2010_v26 }
 0x539   : > { %v2470_v27 = vpop.f32.mrf.mxu3 }
 0x53a   : > { %v2471_v31 = vadd.f32 %v3691_v21, %v2470_v27 }
 0x53e   : > { %v2484_v28 = vpop.f32.mrf.mxu0 }
 0x53f   : > { %v2485_v33 = vadd.f32 %v2484_v28, %v2471_v31  ;;  %v2512_v35 = vpop.f32.mrf.mxu1 }
 0x541   : > { %v2472_v29 = vpop.f32.mrf.mxu3 }
 0x542   : > { %v2473_v38 = vadd.f32 %v3691_v21, %v2472_v29 }
 0x544   : > { %v2498_v30 = vpop.f32.mrf.mxu2 }
 0x545   : > { %v2499_v34 = vadd.f32 %v2498_v30, %v2485_v33 }
 0x546   : > { %v2486_v32 = vpop.f32.mrf.mxu0 }
 0x547   : > { %v2513_v39 = vadd.f32 %v2512_v35, %v2499_v34  ;;  %v2487_v41 = vadd.f32 %v2486_v32, %v2473_v38  ;;  %v2514_v45 = vpop.f32.mrf.mxu1 }
 0x549   : > { %v2526_v36 = vpop.f32.mrf.mxu3 }
 0x54a   : > { %v2527_v42 = vadd.f32 %v2526_v36, %v2513_v39 }
 0x54c   : > { %v2500_v37 = vpop.f32.mrf.mxu2 }
 0x54d   : > { %v2501_v43 = vadd.f32 %v2500_v37, %v2487_v41 }
 0x54e   : > { %v2540_v40 = vpop.f32.mrf.mxu0 }
 0x54f   : > { %v2541_v44 = vadd.f32 %v2540_v40, %v2527_v42  ;;  %v2515_v47 = vadd.f32 %v2514_v45, %v2501_v43 }
 0x551   : > { %v2528_v49 = vpop.f32.mrf.mxu3 }
 0x552   : > { %v2529_v52 = vadd.f32 %v2528_v49, %v2515_v47 }
 0x554   : > { %v2554_v46 = vpop.f32.mrf.mxu2 }
 0x555   : > { %v2555_v48 = vadd.f32 %v2554_v46, %v2541_v44 }
 0x556   : > { %v2542_v51 = vpop.f32.mrf.mxu0 }
 0x557   : > { %v3455_v50 = vmul.f32 -1.442695, %v2555_v48  ;;  %v2543_v53 = vadd.f32 %v2542_v51, %v2529_v52 }
 0x559   : > { %3692 = vpow2.f32 %v3455_v50 }
 0x55c   : > { %v2556_v54 = vpop.f32.mrf.mxu2 }
 0x55d   : > { %v2557_v55 = vadd.f32 %v2556_v54, %v2543_v53 }
 0x55f   : > { %v3693_v56 = vpop.eup %3692  ;;  %v3456_v57 = vmul.f32 -1.442695, %v2557_v55 }
 0x560   : > { %v2565_v58 = vadd.f32 1.0, %v3693_v56 }
 0x561   : > { %3694 = vpow2.f32 %v3456_v57 }
 0x562   : > { %3696 = vrcp.f32 %v2565_v58  ;;  %v2578_v0 = vand.u32 2147483648, %v2565_v58  ;;  %v2576_v3 = vand.u32 2147483647, %v2565_v58  ;;  %vm2572_vm9 = vweird.f32 %v2565_v58 }
 0x564   : > { %v2579_v6 = vor.u32 1.1754944e-38, %v2578_v0  ;;  %vm2577_vm11 = vcmp.eq.f32.partialorder %v2576_v3, 8.507059e+37 }
 0x567   : > { %v3695_v59 = vpop.eup %3694 }
 0x568   : > { %v3697_v60 = vpop.eup %3696  ;;  %v2566_v61 = vadd.f32 1.0, %v3695_v59 }
 0x569   : > { %v2568_v62 = vmul.f32 %v3697_v60, %v2565_v58  ;;  %vm2573_vm8 = vweird.f32 %v3697_v60 }
 0x56a   : > { %3698 = vrcp.f32 %v2566_v61  ;;  %vm2574_vm10 = vmor %vm2572_vm9, %vm2573_vm8  ;;  %v2593_v15 = vand.u32 2147483648, %v2566_v61  ;;  %v2591_v17 = vand.u32 2147483647, %v2566_v61  ;;  %vm2587_vm13 = vweird.f32 %v2566_v61 }
 0x56b   : > { %v2569_v63 = vsub.f32 1.0, %v2568_v62 }
 0x56c   : > { %v2594_v19 = vor.u32 1.1754944e-38, %v2593_v15  ;;  %vm2592_vm15 = vcmp.eq.f32.partialorder %v2591_v17, 8.507059e+37 }
 0x56d   : > { %v2570_v1 = vmul.f32 %v3697_v60, %v2569_v63 }
 0x56f   : > { %v2571_v4 = vadd.f32 %v3697_v60, %v2570_v1 }
 0x570   : > { %v3699_v5 = vpop.eup %3698 }
 0x571   : > { %v2575_v7 = vsel %vm2574_vm10, %v3697_v60, %v2571_v4  ;;  %v2583_v8 = vmul.f32 %v3699_v5, %v2566_v61  ;;  %vm2588_vm12 = vweird.f32 %v3699_v5 }
 0x572   : > { %v2580_v9 = vsel %vm2577_vm11, %v2579_v6, %v2575_v7  ;;  %vm2589_vm14 = vmor %vm2587_vm13, %vm2588_vm12 }
 0x573   : > { %v2597_v12 = vmul.f32 %v3700_v10, %v2580_v9  ;;  %v3457_v13 = vadd.f32 -1.0, %v2580_v9  ;;  %v2584_v14 = vsub.f32 1.0, %v2583_v8 }
 0x575   : > { %v2601_v16 = vadd.f32 %v3457_v13, %v2597_v12  ;;  %v2585_v2 = vmul.f32 %v3699_v5, %v2584_v14 }
 0x577   : > { %2603 = vst [vmem:[%s409_s16] sm:$0xff] %v2601_v16  ;;  %v2586_v18 = vadd.f32 %v3699_v5, %v2585_v2 }
 0x579   : > { %v2590_v20 = vsel %vm2589_vm14, %v3699_v5, %v2586_v18 }
 0x57a   : > { %v2595_v22 = vsel %vm2592_vm15, %v2594_v19, %v2590_v20 }
 0x57b   : > { %v2598_v11 = vmul.f32 %v3701_v23, %v2595_v22  ;;  %v3458_v24 = vadd.f32 -1.0, %v2595_v22 }
 0x57d   : > { %v2602_v25 = vadd.f32 %v3458_v24, %v2598_v11 }
 0x57f   : > { %2604 = vst [vmem:[%s409_s16 + $0x8] sm:$0xff] %v2602_v25 }
 0x580 PF: > { %s22_s13 = sadd.s32 1, %s3806_s13  }
 0x581   : > { %p19_p7 = scmp.ge.s32.totalorder %s22_s13, 4  }
 0x583   :  { %21 = sbr.rel (!%p19_p7) target bundleno = 2 (0x2), region = 103 }
 0x588   :  { %2626 = vsyncpa [#allocation3], 1 }
 0x589   :  { %2628 = vsyncpa [#allocation3 + $0x1], 1 }
 0x58a   :  { %2629 = vsyncpa [#allocation5], 1 }

</bundles_post_ra>
